<compile_context>
chip_gen: v5e
topology: v5e:2x2
jax: 0.10.0
libtpu: 0.0.40
codegen_flags: <defaults>
</compile_context>

<pallas_src>
import functools

import jax
import jax.numpy as jnp
from jax.experimental import pallas as pl
from jax.experimental.pallas import tpu as pltpu


# ----------------------------------------------------------------------------
# Pallas kernel: one mean-field iteration of the CRF-RNN.
#   grid = (num_query_tiles, num_key_blocks); key axis is the reduction axis.
# ----------------------------------------------------------------------------
def crf_iter_kernel(fsp_q, fsp_k, fbi_q, fbi_k, sm_k, un_q, cspT, cbiT,
                    qnew_ref, acc_sp, acc_bi, *, n_inner, tk_inner):
    """Class-major CRF message-passing step.

    fsp_q : (TQ, Fsp)        f32  augmented spatial feats, query side (pixel-major)
    fsp_k : (Fsp, TK_outer)  f32  augmented spatial feats, key side (feature-major)
    fbi_q : (TQ, Fbi)        f32  augmented bilateral feats, query side
    fbi_k : (Fbi, TK_outer)  f32  augmented bilateral feats, key side
    sm_k  : (C+1, TK_outer)  bf16 softmax(q) over classes + appended ones row
    un_q  : (C, TQ)          f32  unary potentials, query tile
    cspT / cbiT : (C, C)     f32  kernel_weight * compatibility, transposed
    """
    k = pl.program_id(1)

    @pl.when(k == 0)
    def _():
        acc_sp[...] = jnp.zeros_like(acc_sp)
        acc_bi[...] = jnp.zeros_like(acc_bi)

    # loop-invariant query-side operands
    fq_sp = fsp_q[...]                               # (TQ, Fsp)
    fq_bi = fbi_q[...]                               # (TQ, Fbi)
    nt = (((1,), (1,)), ((), ()))                    # contract the key axis (NT)

    def body(j, carry):
        a_sp, a_bi = carry
        off = pl.multiple_of(j * tk_inner, tk_inner)
        smj = sm_k[:, pl.ds(off, tk_inner)]          # (C+1, TKi) bf16
        # Augmented features:  f_q . f_k == -0.5 * ||f_q - f_k||^2, so each
        # weight tile is one matmul + one exp.  Logit/exp stay f32 (large
        # squared norms must cancel exactly against the cross term; v5e has no
        # bf16 VPU/EUP).  Spatial fully, then bilateral: only one (TQ, TKi)
        # weight temporary is live at a time (vreg pressure).
        wT = jnp.exp(jnp.dot(fq_sp, fsp_k[:, pl.ds(off, tk_inner)],
                             preferred_element_type=jnp.float32))   # (TQ, TKi)
        a_sp = a_sp + jax.lax.dot_general(smj, wT.astype(jnp.bfloat16), nt,
                                          preferred_element_type=jnp.float32)
        wT = jnp.exp(jnp.dot(fq_bi, fbi_k[:, pl.ds(off, tk_inner)],
                             preferred_element_type=jnp.float32))
        a_bi = a_bi + jax.lax.dot_general(smj, wT.astype(jnp.bfloat16), nt,
                                          preferred_element_type=jnp.float32)
        return a_sp, a_bi

    a_sp, a_bi = jax.lax.fori_loop(0, n_inner, body,
                                   (acc_sp[...], acc_bi[...]),
                                   unroll=min(4, n_inner))
    acc_sp[...] = a_sp
    acc_bi[...] = a_bi

    @pl.when(k == pl.num_programs(1) - 1)
    def _():
        C = qnew_ref.shape[0]
        a_sp = acc_sp[...]
        a_bi = acc_bi[...]
        # last accumulator row == filter applied to the all-ones image == norm
        # (exact division: the epilogue runs once per query tile, and the bf16
        #  message matmuls already consume most of the error budget)
        sp = a_sp[:C, :] / a_sp[C:C + 1, :]
        bi = a_bi[:C, :] / a_bi[C:C + 1, :]
        # pairwise^T = compat^T @ (bw*bi + sw*sp)  (weights folded into cbiT/cspT)
        pairwise = (jnp.dot(cbiT[...], bi, preferred_element_type=jnp.float32)
                    + jnp.dot(cspT[...], sp, preferred_element_type=jnp.float32))
        qnew_ref[...] = un_q[...] - pairwise


def make_iter_step(N, C, fsp_dim, fbi_dim, TQ, TK_outer, TK_inner):
    assert N % TQ == 0 and N % TK_outer == 0 and TK_outer % TK_inner == 0
    n_inner = TK_outer // TK_inner
    grid = (N // TQ, N // TK_outer)
    kernel = functools.partial(crf_iter_kernel, n_inner=n_inner,
                               tk_inner=TK_inner)
    return pl.pallas_call(
        kernel,
        out_shape=jax.ShapeDtypeStruct((C, N), jnp.float32),
        grid_spec=pltpu.PrefetchScalarGridSpec(
            num_scalar_prefetch=0,
            grid=grid,
            in_specs=[
                pl.BlockSpec((TQ, fsp_dim), lambda i, k: (i, 0)),
                pl.BlockSpec((fsp_dim, TK_outer), lambda i, k: (0, k)),
                pl.BlockSpec((TQ, fbi_dim), lambda i, k: (i, 0)),
                pl.BlockSpec((fbi_dim, TK_outer), lambda i, k: (0, k)),
                pl.BlockSpec((C + 1, TK_outer), lambda i, k: (0, k)),
                pl.BlockSpec((C, TQ), lambda i, k: (0, i)),
                pl.BlockSpec((C, C), lambda i, k: (0, 0)),
                pl.BlockSpec((C, C), lambda i, k: (0, 0)),
            ],
            out_specs=pl.BlockSpec((C, TQ), lambda i, k: (0, i)),
            scratch_shapes=[
                pltpu.VMEM((C + 1, TQ), jnp.float32),   # spatial acc (+norm row)
                pltpu.VMEM((C + 1, TQ), jnp.float32),   # bilateral acc (+norm row)
            ],
        ),
        compiler_params=pltpu.CompilerParams(
            dimension_semantics=("parallel", "arbitrary")),
    )


def _pick_tk_outer(N, tk_inner=128, cap=4096):
    best = tk_inner
    t = tk_inner
    while t <= min(N, cap):
        if N % t == 0:
            best = t
        t += tk_inner
    return best


def _pick_tq(N):
    # 256-wide query tiles fill the 2x256^2 MXU on v6e/v7x and halve key-side
    # re-streaming; v5e's MXU is 4x128^2 so 128-wide tiles are right there.
    kind = ""
    try:
        kind = jax.devices()[0].device_kind.lower()
    except Exception:
        pass
    small_mxu = any(v in kind for v in ("v2", "v3", "v4", "v5"))
    if (not small_mxu) and N % 256 == 0:
        return 256
    return 128


# ----------------------------------------------------------------------------
# Wrapper reproducing CrfRnnLayer.forward (glue in plain JAX)
# ----------------------------------------------------------------------------
@functools.partial(jax.jit, static_argnames=(
    "num_class", "num_iter", "theta_alpha", "theta_beta", "theta_gamma"))
def crfrnn_forward(unary, rgb, params, *, num_class, num_iter,
                   theta_alpha, theta_beta, theta_gamma):
    # unary: (1, num_class, H, W), rgb: (1, channel, H, W)  -- batch must be 1
    assert unary.shape[0] == 1 and rgb.shape[0] == 1
    _, C, H, W = unary.shape
    assert C == num_class
    N = H * W
    assert N % 128 == 0, "H*W must be a multiple of 128"

    TK_inner = 128
    TQ = _pick_tq(N)
    TK_outer = _pick_tk_outer(N, TK_inner)

    # class-major: classes on sublanes, pixels on lanes.
    unT = unary[0].reshape(C, N).astype(jnp.float32)                    # (C, N)
    img = jnp.transpose(rgb[0], (1, 2, 0)).reshape(N, -1).astype(jnp.float32)

    yy, xx = jnp.meshgrid(jnp.arange(H, dtype=jnp.float32),
                          jnp.arange(W, dtype=jnp.float32), indexing="ij")
    pos = jnp.stack([xx.reshape(N), yy.reshape(N)], axis=-1)            # (N, 2)

    feat_sp = pos / theta_gamma                                         # spatial feats
    feat_bi = jnp.concatenate([pos / theta_alpha, img / theta_beta], axis=-1)

    # Augment so  f_query . f_key == -0.5 * ||f_q - f_k||^2  (squared norms
    # computed once here).  Query side is pixel-major (MXU LHS); key side is
    # feature-major (F, N) so the stream re-fetched for every query tile and
    # iteration is lane-dense (pixels on the 128-lane axis).
    def augment(f):
        sq = jnp.sum(f * f, axis=-1, keepdims=True)                     # (N, 1)
        ones = jnp.ones_like(sq)
        f_q = jnp.concatenate([f, ones, -0.5 * sq], axis=-1)            # (N, d+2)
        f_kT = jnp.concatenate([f, -0.5 * sq, ones], axis=-1).T         # (d+2, N)
        return f_q, f_kT

    fsp_q, fsp_k = augment(feat_sp)
    fbi_q, fbi_k = augment(feat_bi)

    # "instanciate": scalar kernel weights, compat matrix diag=c0 / off-diag=c1,
    # weights folded into the transposed compatibility matrices.
    compat = jnp.where(jnp.eye(C, dtype=bool),
                       params["compatibility_matrix"][0],
                       params["compatibility_matrix"][1]).astype(jnp.float32)
    cspT = (params["spatial_ker_weights"][0] * compat).T
    cbiT = (params["bilateral_ker_weights"][0] * compat).T

    step = make_iter_step(N, C, fsp_q.shape[-1], fbi_q.shape[-1],
                          TQ, TK_outer, TK_inner)

    ones_row = jnp.ones((1, N), jnp.float32)
    q = unT
    for _ in range(num_iter):
        # softmax over classes hoisted out of the kernel; the appended ones row
        # folds the filter norm into the same MXU matmul as the message pass.
        # Stored flat class-major (C+1, N) in bf16: lane-dense key blocks, no
        # per-iteration reshape/transpose, half the softmax HBM traffic.
        sm_aug = jnp.concatenate([jax.nn.softmax(q, axis=0), ones_row],
                                 axis=0).astype(jnp.bfloat16)
        q = step(fsp_q, fsp_k, fbi_q, fbi_k, sm_aug, unT, cspT, cbiT)

    # already class-major: q_values.permute([2, 0, 1]) is a free reshape
    return q.reshape(C, H, W)


# ----------------------------------------------------------------------------
# Pure-JAX reference (dense Gaussian filtering, f32) for verification
# ----------------------------------------------------------------------------
def crfrnn_reference(unary, rgb, params, *, num_class, num_iter,
                     theta_alpha, theta_beta, theta_gamma):
    _, C, H, W = unary.shape
    N = H * W
    un = jnp.transpose(unary[0], (1, 2, 0)).reshape(N, C).astype(jnp.float32)
    img = jnp.transpose(rgb[0], (1, 2, 0)).reshape(N, -1).astype(jnp.float32)
    yy, xx = jnp.meshgrid(jnp.arange(H, dtype=jnp.float32),
                          jnp.arange(W, dtype=jnp.float32), indexing="ij")
    pos = jnp.stack([xx.reshape(N), yy.reshape(N)], axis=-1)
    fsp = pos / theta_gamma
    fbi = jnp.concatenate([pos / theta_alpha, img / theta_beta], axis=-1)

    def sqdist(a, b):
        return (jnp.sum(a * a, -1, keepdims=True) + jnp.sum(b * b, -1)[None, :]
                - 2.0 * a @ b.T)

    w_sp = jnp.exp(-0.5 * sqdist(fsp, fsp))
    w_bi = jnp.exp(-0.5 * sqdist(fbi, fbi))
    nsp = jnp.sum(w_sp, -1, keepdims=True)
    nbi = jnp.sum(w_bi, -1, keepdims=True)

    compat = jnp.where(jnp.eye(C, dtype=bool),
                       params["compatibility_matrix"][0],
                       params["compatibility_matrix"][1]).astype(jnp.float32)
    sw = params["spatial_ker_weights"][0]
    bw = params["bilateral_ker_weights"][0]

    q = un
    for _ in range(num_iter):
        sm = jax.nn.softmax(q, axis=-1)
        sp = (w_sp @ sm) / nsp
        bi = (w_bi @ sm) / nbi
        message = bw * bi + sw * sp
        q = un - message @ compat
    return jnp.transpose(q.reshape(H, W, C), (2, 0, 1))


if __name__ == "__main__":
    # Module hyper-parameters
    num_class = 4
    num_iter = 3
    theta_alpha = 8.0
    theta_beta = 0.5
    theta_gamma = 3.0

    # Deterministic parameter init (values from reset_parameters)
    params = {
        "spatial_ker_weights": jnp.array([2.0], jnp.float32),
        "bilateral_ker_weights": jnp.array([2.0], jnp.float32),
        "compatibility_matrix": jnp.array([0.0, 1.0], jnp.float32),
        "w1": jnp.array([0.1], jnp.float32),   # unused in forward
        "w2": jnp.array([0.1], jnp.float32),   # unused in forward
        "w3": jnp.array([0.4], jnp.float32),   # unused in forward
        "w4": jnp.array([0.5], jnp.float32),   # unused in forward
    }

    # Small deterministic inputs: unary (1, num_class, H, W), rgb (1, 3, H, W)
    key = jax.random.PRNGKey(0)
    k1, k2 = jax.random.split(key)
    H = W = 16
    unary = jax.random.normal(k1, (1, num_class, H, W), jnp.float32)
    rgb = jax.random.uniform(k2, (1, 3, H, W), jnp.float32)

    out = crfrnn_forward(unary, rgb, params,
                         num_class=num_class, num_iter=num_iter,
                         theta_alpha=theta_alpha, theta_beta=theta_beta,
                         theta_gamma=theta_gamma)
    out = jax.block_until_ready(out)
    assert out.shape == (num_class, H, W)

    ref = crfrnn_reference(unary, rgb, params,
                           num_class=num_class, num_iter=num_iter,
                           theta_alpha=theta_alpha, theta_beta=theta_beta,
                           theta_gamma=theta_gamma)
    # Tolerance accounts for the intentional bf16 MXU-operand path on the
    # message/norm accumulation (per perf review); the f32 path matches ~1e-3.
    assert jnp.allclose(out, ref, atol=2e-2, rtol=2e-2), (
        float(jnp.max(jnp.abs(out - ref))))

    print("KERNEL_OK")
</pallas_src>

<mosaic_0001>
module attributes {stable_mosaic.version = 11 : i64} {
  func.func @crf_iter_kernel(%arg0: i32, %arg1: i32, %arg2: memref<256x4xf32, #tpu.memory_space<vmem>>, %arg3: memref<4x256xf32, #tpu.memory_space<vmem>>, %arg4: memref<256x7xf32, #tpu.memory_space<vmem>>, %arg5: memref<7x256xf32, #tpu.memory_space<vmem>>, %arg6: memref<5x256xbf16, #tpu.memory_space<vmem>>, %arg7: memref<4x256xf32, #tpu.memory_space<vmem>>, %arg8: memref<4x4xf32, #tpu.memory_space<vmem>>, %arg9: memref<4x4xf32, #tpu.memory_space<vmem>>, %arg10: memref<4x256xf32, #tpu.memory_space<vmem>>, %arg11: memref<5x256xf32, #tpu.memory_space<vmem>>, %arg12: memref<5x256xf32, #tpu.memory_space<vmem>>) attributes {dimension_semantics = [#tpu.dimension_semantics<parallel>, #tpu.dimension_semantics<arbitrary>], iteration_bounds = array<i64: 1, 1>, scalar_prefetch = 0 : i64, scratch_operands = 2 : i64, tpu.core_type = #tpu.core_type<tc>, window_params = [{transform_indices = @transform_0, window_bounds = array<i64: 256, 4>}, {transform_indices = @transform_1, window_bounds = array<i64: 4, 256>}, {transform_indices = @transform_2, window_bounds = array<i64: 256, 7>}, {transform_indices = @transform_3, window_bounds = array<i64: 7, 256>}, {transform_indices = @transform_4, window_bounds = array<i64: 5, 256>}, {transform_indices = @transform_5, window_bounds = array<i64: 4, 256>}, {pipeline_mode = #tpu.pipeline_mode<synchronous>, transform_indices = @transform_6, window_bounds = array<i64: 4, 4>}, {pipeline_mode = #tpu.pipeline_mode<synchronous>, transform_indices = @transform_7, window_bounds = array<i64: 4, 4>}, {transform_indices = @transform_8, window_bounds = array<i64: 4, 256>}]} {
    %c0_i32 = arith.constant 0 : i32
    %0 = arith.cmpi eq, %arg1, %c0_i32 : i32
    %1 = arith.extui %0 : i1 to i32
    %c0_i32_0 = arith.constant 0 : i32
    %2 = arith.cmpi ne, %1, %c0_i32_0 : i32
    scf.if %2 {
      %cst_29 = arith.constant 0.000000e+00 : f32
      %48 = vector.broadcast %cst_29 : f32 to vector<5x256xf32>
      %c0_30 = arith.constant 0 : index
      %c0_31 = arith.constant 0 : index
      %49 = vector.load %arg11[%c0_30, %c0_31] : memref<5x256xf32, #tpu.memory_space<vmem>>, vector<5x256xf32>
      tpu.vector_store %arg11[%c0_30, %c0_31], %48 {strides = array<i32>} : memref<5x256xf32, #tpu.memory_space<vmem>>, vector<5x256xf32>,
      %cst_32 = arith.constant 0.000000e+00 : f32
      %50 = vector.broadcast %cst_32 : f32 to vector<5x256xf32>
      %c0_33 = arith.constant 0 : index
      %c0_34 = arith.constant 0 : index
      %51 = vector.load %arg12[%c0_33, %c0_34] : memref<5x256xf32, #tpu.memory_space<vmem>>, vector<5x256xf32>
      tpu.vector_store %arg12[%c0_33, %c0_34], %50 {strides = array<i32>} : memref<5x256xf32, #tpu.memory_space<vmem>>, vector<5x256xf32>,
    } else {
    }
    %c0 = arith.constant 0 : index
    %c0_1 = arith.constant 0 : index
    %3 = vector.load %arg2[%c0, %c0_1] : memref<256x4xf32, #tpu.memory_space<vmem>>, vector<256x4xf32>
    %c0_2 = arith.constant 0 : index
    %c0_3 = arith.constant 0 : index
    %4 = vector.load %arg4[%c0_2, %c0_3] : memref<256x7xf32, #tpu.memory_space<vmem>>, vector<256x7xf32>
    %c0_4 = arith.constant 0 : index
    %c0_5 = arith.constant 0 : index
    %5 = vector.load %arg11[%c0_4, %c0_5] : memref<5x256xf32, #tpu.memory_space<vmem>>, vector<5x256xf32>
    %c0_6 = arith.constant 0 : index
    %c0_7 = arith.constant 0 : index
    %6 = vector.load %arg12[%c0_6, %c0_7] : memref<5x256xf32, #tpu.memory_space<vmem>>, vector<5x256xf32>
    %c0_i32_8 = arith.constant 0 : i32
    %c128_i32 = arith.constant 128 : i32
    %7 = arith.muli %c0_i32_8, %c128_i32 : i32
    %8 = tpu.assume_multiple %7, 128 : i32
    %c0_9 = arith.constant 0 : index
    %9 = arith.index_cast %8 : i32 to index
    %10 = vector.load %arg6[%c0_9, %9] : memref<5x256xbf16, #tpu.memory_space<vmem>>, vector<5x128xbf16>
    %c0_10 = arith.constant 0 : index
    %11 = arith.index_cast %8 : i32 to index
    %12 = vector.load %arg3[%c0_10, %11] : memref<4x256xf32, #tpu.memory_space<vmem>>, vector<4x128xf32>
    %cst = arith.constant dense<0.000000e+00> : vector<256x128xf32>
    %13 = tpu.matmul %3, %12, %cst {dimension_numbers = #tpu.dot_dimension_numbers<[1], [0], [0], [1], [0, 0, 1, 1], [], []>} : vector<256x4xf32>, vector<4x128xf32>, vector<256x128xf32> -> vector<256x128xf32>
    %14 = math.exp %13 : vector<256x128xf32>
    %15 = arith.truncf %14 : vector<256x128xf32> to vector<256x128xbf16>
    %cst_11 = arith.constant dense<0.000000e+00> : vector<5x256xf32>
    %16 = tpu.matmul %10, %15, %cst_11 {dimension_numbers = #tpu.dot_dimension_numbers<[1], [1], [0], [0], [0, 0, 1, 0], [], []>} : vector<5x128xbf16>, vector<256x128xbf16>, vector<5x256xf32> -> vector<5x256xf32>
    %17 = arith.addf %5, %16 : vector<5x256xf32>
    %c0_12 = arith.constant 0 : index
    %18 = arith.index_cast %8 : i32 to index
    %19 = vector.load %arg5[%c0_12, %18] : memref<7x256xf32, #tpu.memory_space<vmem>>, vector<7x128xf32>
    %cst_13 = arith.constant dense<0.000000e+00> : vector<256x128xf32>
    %20 = tpu.matmul %4, %19, %cst_13 {dimension_numbers = #tpu.dot_dimension_numbers<[1], [0], [0], [1], [0, 0, 1, 1], [], []>} : vector<256x7xf32>, vector<7x128xf32>, vector<256x128xf32> -> vector<256x128xf32>
    %21 = math.exp %20 : vector<256x128xf32>
    %22 = arith.truncf %21 : vector<256x128xf32> to vector<256x128xbf16>
    %cst_14 = arith.constant dense<0.000000e+00> : vector<5x256xf32>
    %23 = tpu.matmul %10, %22, %cst_14 {dimension_numbers = #tpu.dot_dimension_numbers<[1], [1], [0], [0], [0, 0, 1, 0], [], []>} : vector<5x128xbf16>, vector<256x128xbf16>, vector<5x256xf32> -> vector<5x256xf32>
    %24 = arith.addf %6, %23 : vector<5x256xf32>
    %c1_i32 = arith.constant 1 : i32
    %c128_i32_15 = arith.constant 128 : i32
    %25 = arith.muli %c1_i32, %c128_i32_15 : i32
    %26 = tpu.assume_multiple %25, 128 : i32
    %c0_16 = arith.constant 0 : index
    %27 = arith.index_cast %26 : i32 to index
    %28 = vector.load %arg6[%c0_16, %27] : memref<5x256xbf16, #tpu.memory_space<vmem>>, vector<5x128xbf16>
    %c0_17 = arith.constant 0 : index
    %29 = arith.index_cast %26 : i32 to index
    %30 = vector.load %arg3[%c0_17, %29] : memref<4x256xf32, #tpu.memory_space<vmem>>, vector<4x128xf32>
    %cst_18 = arith.constant dense<0.000000e+00> : vector<256x128xf32>
    %31 = tpu.matmul %3, %30, %cst_18 {dimension_numbers = #tpu.dot_dimension_numbers<[1], [0], [0], [1], [0, 0, 1, 1], [], []>} : vector<256x4xf32>, vector<4x128xf32>, vector<256x128xf32> -> vector<256x128xf32>
    %32 = math.exp %31 : vector<256x128xf32>
    %33 = arith.truncf %32 : vector<256x128xf32> to vector<256x128xbf16>
    %cst_19 = arith.constant dense<0.000000e+00> : vector<5x256xf32>
    %34 = tpu.matmul %28, %33, %cst_19 {dimension_numbers = #tpu.dot_dimension_numbers<[1], [1], [0], [0], [0, 0, 1, 0], [], []>} : vector<5x128xbf16>, vector<256x128xbf16>, vector<5x256xf32> -> vector<5x256xf32>
    %35 = arith.addf %17, %34 : vector<5x256xf32>
    %c0_20 = arith.constant 0 : index
    %36 = arith.index_cast %26 : i32 to index
    %37 = vector.load %arg5[%c0_20, %36] : memref<7x256xf32, #tpu.memory_space<vmem>>, vector<7x128xf32>
    %cst_21 = arith.constant dense<0.000000e+00> : vector<256x128xf32>
    %38 = tpu.matmul %4, %37, %cst_21 {dimension_numbers = #tpu.dot_dimension_numbers<[1], [0], [0], [1], [0, 0, 1, 1], [], []>} : vector<256x7xf32>, vector<7x128xf32>, vector<256x128xf32> -> vector<256x128xf32>
    %39 = math.exp %38 : vector<256x128xf32>
    %40 = arith.truncf %39 : vector<256x128xf32> to vector<256x128xbf16>
    %cst_22 = arith.constant dense<0.000000e+00> : vector<5x256xf32>
    %41 = tpu.matmul %28, %40, %cst_22 {dimension_numbers = #tpu.dot_dimension_numbers<[1], [1], [0], [0], [0, 0, 1, 0], [], []>} : vector<5x128xbf16>, vector<256x128xbf16>, vector<5x256xf32> -> vector<5x256xf32>
    %42 = arith.addf %24, %41 : vector<5x256xf32>
    %c2_i32 = arith.constant 2 : i32
    %c0_23 = arith.constant 0 : index
    %c0_24 = arith.constant 0 : index
    %43 = vector.load %arg11[%c0_23, %c0_24] : memref<5x256xf32, #tpu.memory_space<vmem>>, vector<5x256xf32>
    tpu.vector_store %arg11[%c0_23, %c0_24], %35 {strides = array<i32>} : memref<5x256xf32, #tpu.memory_space<vmem>>, vector<5x256xf32>,
    %c0_25 = arith.constant 0 : index
    %c0_26 = arith.constant 0 : index
    %44 = vector.load %arg12[%c0_25, %c0_26] : memref<5x256xf32, #tpu.memory_space<vmem>>, vector<5x256xf32>
    tpu.vector_store %arg12[%c0_25, %c0_26], %42 {strides = array<i32>} : memref<5x256xf32, #tpu.memory_space<vmem>>, vector<5x256xf32>,
    %c0_i32_27 = arith.constant 0 : i32
    %45 = arith.cmpi eq, %arg1, %c0_i32_27 : i32
    %46 = arith.extui %45 : i1 to i32
    %c0_i32_28 = arith.constant 0 : i32
    %47 = arith.cmpi ne, %46, %c0_i32_28 : i32
    scf.if %47 {
      %c0_29 = arith.constant 0 : index
      %c0_30 = arith.constant 0 : index
      %48 = vector.load %arg11[%c0_29, %c0_30] : memref<5x256xf32, #tpu.memory_space<vmem>>, vector<5x256xf32>
      %c0_31 = arith.constant 0 : index
      %c0_32 = arith.constant 0 : index
      %49 = vector.load %arg12[%c0_31, %c0_32] : memref<5x256xf32, #tpu.memory_space<vmem>>, vector<5x256xf32>
      %50 = vector.extract_strided_slice %48 {offsets = [0, 0], sizes = [4, 256], strides = [1, 1]} : vector<5x256xf32> to vector<4x256xf32>
      %51 = vector.extract_strided_slice %48 {offsets = [4, 0], sizes = [1, 256], strides = [1, 1]} : vector<5x256xf32> to vector<1x256xf32>
      %52 = vector.broadcast %51 : vector<1x256xf32> to vector<4x256xf32>
      %53 = arith.divf %50, %52 : vector<4x256xf32>
      %54 = vector.extract_strided_slice %49 {offsets = [0, 0], sizes = [4, 256], strides = [1, 1]} : vector<5x256xf32> to vector<4x256xf32>
      %55 = vector.extract_strided_slice %49 {offsets = [4, 0], sizes = [1, 256], strides = [1, 1]} : vector<5x256xf32> to vector<1x256xf32>
      %56 = vector.broadcast %55 : vector<1x256xf32> to vector<4x256xf32>
      %57 = arith.divf %54, %56 : vector<4x256xf32>
      %c0_33 = arith.constant 0 : index
      %c0_34 = arith.constant 0 : index
      %58 = vector.load %arg9[%c0_33, %c0_34] : memref<4x4xf32, #tpu.memory_space<vmem>>, vector<4x4xf32>
      %cst_35 = arith.constant dense<0.000000e+00> : vector<4x256xf32>
      %59 = tpu.matmul %58, %57, %cst_35 {dimension_numbers = #tpu.dot_dimension_numbers<[1], [0], [0], [1], [0, 0, 1, 1], [], []>} : vector<4x4xf32>, vector<4x256xf32>, vector<4x256xf32> -> vector<4x256xf32>
      %c0_36 = arith.constant 0 : index
      %c0_37 = arith.constant 0 : index
      %60 = vector.load %arg8[%c0_36, %c0_37] : memref<4x4xf32, #tpu.memory_space<vmem>>, vector<4x4xf32>
      %cst_38 = arith.constant dense<0.000000e+00> : vector<4x256xf32>
      %61 = tpu.matmul %60, %53, %cst_38 {dimension_numbers = #tpu.dot_dimension_numbers<[1], [0], [0], [1], [0, 0, 1, 1], [], []>} : vector<4x4xf32>, vector<4x256xf32>, vector<4x256xf32> -> vector<4x256xf32>
      %62 = arith.addf %59, %61 : vector<4x256xf32>
      %c0_39 = arith.constant 0 : index
      %c0_40 = arith.constant 0 : index
      %63 = vector.load %arg7[%c0_39, %c0_40] : memref<4x256xf32, #tpu.memory_space<vmem>>, vector<4x256xf32>
      %64 = arith.subf %63, %62 : vector<4x256xf32>
      %c0_41 = arith.constant 0 : index
      %c0_42 = arith.constant 0 : index
      %65 = vector.load %arg10[%c0_41, %c0_42] : memref<4x256xf32, #tpu.memory_space<vmem>>, vector<4x256xf32>
      tpu.vector_store %arg10[%c0_41, %c0_42], %64 {strides = array<i32>} : memref<4x256xf32, #tpu.memory_space<vmem>>, vector<4x256xf32>,
    } else {
    }
    return
  }
  func.func @transform_0(%arg0: i32, %arg1: i32) -> (i32, i32) {
    %c0_i32 = arith.constant 0 : i32
    %c0_i32_0 = arith.constant 0 : i32
    return %arg0, %c0_i32 : i32, i32
  }
  func.func @transform_1(%arg0: i32, %arg1: i32) -> (i32, i32) {
    %c0_i32 = arith.constant 0 : i32
    %c0_i32_0 = arith.constant 0 : i32
    return %c0_i32, %arg1 : i32, i32
  }
  func.func @transform_2(%arg0: i32, %arg1: i32) -> (i32, i32) {
    %c0_i32 = arith.constant 0 : i32
    %c0_i32_0 = arith.constant 0 : i32
    return %arg0, %c0_i32 : i32, i32
  }
  func.func @transform_3(%arg0: i32, %arg1: i32) -> (i32, i32) {
    %c0_i32 = arith.constant 0 : i32
    %c0_i32_0 = arith.constant 0 : i32
    return %c0_i32, %arg1 : i32, i32
  }
  func.func @transform_4(%arg0: i32, %arg1: i32) -> (i32, i32) {
    %c0_i32 = arith.constant 0 : i32
    %c0_i32_0 = arith.constant 0 : i32
    return %c0_i32, %arg1 : i32, i32
  }
  func.func @transform_5(%arg0: i32, %arg1: i32) -> (i32, i32) {
    %c0_i32 = arith.constant 0 : i32
    %c0_i32_0 = arith.constant 0 : i32
    return %c0_i32, %arg0 : i32, i32
  }
  func.func @transform_6(%arg0: i32, %arg1: i32) -> (i32, i32) {
    %c0_i32 = arith.constant 0 : i32
    %c0_i32_0 = arith.constant 0 : i32
    %c0_i32_1 = arith.constant 0 : i32
    return %c0_i32, %c0_i32_0 : i32, i32
  }
  func.func @transform_7(%arg0: i32, %arg1: i32) -> (i32, i32) {
    %c0_i32 = arith.constant 0 : i32
    %c0_i32_0 = arith.constant 0 : i32
    %c0_i32_1 = arith.constant 0 : i32
    return %c0_i32, %c0_i32_0 : i32, i32
  }
  func.func @transform_8(%arg0: i32, %arg1: i32) -> (i32, i32) {
    %c0_i32 = arith.constant 0 : i32
    %c0_i32_0 = arith.constant 0 : i32
    return %c0_i32, %arg0 : i32, i32
  }
}

</mosaic_0001>

<bundles_post_ra>
// kernel: squeeze.6
= control target key start
LH: loop header
LB: loop body
LE: loop exit
PB: predicated region body
PF: predicated region fallthrough
CT: control target
= control target key end

     0   :  { %2 = vsyncpa [#allocation1], 0  ;;  %s242_s8 = smov [#allocation0]   ;;  %s290_s0 = inlined_call_operand.hbm [shape: f32[1,4,16,16], index: 0, kind: input, shape index: {}]   ;;  %s291_s1 = inlined_call_operand.vmem [shape: f32[4,256], index: 1, kind: output, shape index: {}]  }
   0x1   :  { %s6_s0 = sshll.u32 %s290_s0, 4  ;;  %s8_s9 = sshll.u32 %s242_s8, 4  ;;  %s7_s0 = int_to_ptr.hbm [resolvable:$true] %s6_s0  ;;  %s9_s9 = int_to_ptr.vmem [resolvable:$true] %s8_s9 }
   0x2   :  { %11 = dma.hbm_to_vmem [thread:$0]  %s7_s0, 1024, %s9_s9, [#allocation1]  }
   0x3   :  { %240 = dma.done.wait [#allocation1], 1024  }
   0x4   :  { %241 = vsyncadd [#allocation1], 4294966272  ;;  %s27_s10 = smov 3  ;;  %s30_s11 = smov 12  ;;  %vm32_vm0 = vcmask 1043458   ;;  %vm37_vm1 = vcmask 1045508  }
   0x5   :  { %s35_s12 = smov 48  ;;  %s40_s13 = smov 192  ;;  %vm42_vm2 = vcmask 1047558   ;;  %v28_v0 = vld [vmem:[#allocation0 + $0x7] ss:$16 sm:%s27_s10]   ;;  %vm16_vm3 = vcmask 1047556  }
   0x6   :  { %s75_s14 = smov 3  ;;  %s78_s15 = smov 12  ;;  %v31_v1 = vld [vmem:[#allocation0 + $0x7] ss:$16 sm:%s30_s11]   ;;  %v36_v2 = vld [vmem:[#allocation0 - $0x31] ss:$16 sm:%s35_s12]  }
   0x7   :  { %s83_s16 = smov 48  ;;  %s88_s17 = smov 192  ;;  %v33_v3 = vsel %vm32_vm0, %v31_v1, %v28_v0  ;;  %v41_v4 = vld [vmem:[#allocation0 - $0x31] ss:$16 sm:%s40_s13]   ;;  %v76_v5 = vld [vmem:[#allocation0 + $0x5] ss:$16 sm:%s75_s14]  }
   0x8   :  { %s51_s18 = smov 3  ;;  %s54_s19 = smov 12  ;;  %v79_v6 = vld [vmem:[#allocation0 + $0x5] ss:$16 sm:%s78_s15]   ;;  %v38_v7 = vsel %vm37_vm1, %v36_v2, %v33_v3  ;;  %v84_v9 = vld [vmem:[#allocation0 - $0x33] ss:$16 sm:%s83_s16]  }
   0x9   :  { %s59_s20 = smov 48  ;;  %s64_s21 = smov 192  ;;  %v81_v8 = vsel %vm32_vm0, %v79_v6, %v76_v5  ;;  %v89_v10 = vld [vmem:[#allocation0 - $0x33] ss:$16 sm:%s88_s17]   ;;  %v52_v11 = vld [vmem:[#allocation0 + $0x6] ss:$16 sm:%s51_s18]   ;;  %v43_v12 = vsel %vm42_vm2, %v41_v4, %v38_v7 }
   0xa   :  { %v86_v13 = vsel %vm37_vm1, %v84_v9, %v81_v8  ;;  %v55_v14 = vld [vmem:[#allocation0 + $0x6] ss:$16 sm:%s54_s19]   ;;  %v60_v15 = vld [vmem:[#allocation0 - $0x32] ss:$16 sm:%s59_s20]   ;;  %s243_s22 = smov 112   ;;  %s99_s23 = smov 3 }
   0xb   :  { %44 = vrot.lane.b32.xlu0 %v43_v12, %s243_s22  ;;  %v91_v16 = vsel %vm42_vm2, %v89_v10, %v86_v13  ;;  %v57_v17 = vsel %vm32_vm0, %v55_v14, %v52_v11  ;;  %s244_s24 = smov 80   ;;  %v65_v18 = vld [vmem:[#allocation0 - $0x32] ss:$16 sm:%s64_s21]   ;;  %v100_v19 = vld [vmem:[#allocation0 + $0x4] ss:$16 sm:%s99_s23]   ;;  %s102_s25 = smov 12 }
   0xc   :  { %92 = vrot.lane.b32.xlu1 %v91_v16, %s244_s24  ;;  %s107_s26 = smov 48  ;;  %v62_v20 = vsel %vm37_vm1, %v60_v15, %v57_v17  ;;  %v103_v21 = vld [vmem:[#allocation0 + $0x4] ss:$16 sm:%s102_s25]   ;;  %s112_s27 = smov 192  ;;  %vm18_vm4 = vcmask 130048   ;;  %vm46_vm5 = vcmask 1048448  }
   0xd   :  { %v108_v22 = vld [vmem:[#allocation0 - $0x34] ss:$16 sm:%s107_s26]   ;;  %v105_v23 = vsel %vm32_vm0, %v103_v21, %v100_v19  ;;  %s171_s28 = smov 3  ;;  %s174_s29 = smov 12  ;;  %v67_v28 = vsel %vm42_vm2, %v65_v18, %v62_v20  ;;  %vm70_vm6 = vcmask 917248   ;;  %vm94_vm7 = vcmask 786048  }
   0xe   :  { %v113_v24 = vld [vmem:[#allocation0 - $0x34] ss:$16 sm:%s112_s27]   ;;  %v110_v25 = vsel %vm37_vm1, %v108_v22, %v105_v23  ;;  %v172_v26 = vld [vmem:[#allocation0 + $0x1] ss:$16 sm:%s171_s28]   ;;  %s179_s30 = smov 48  ;;  %s184_s2 = smov 192 }
   0xf   :  { %v175_v27 = vld [vmem:[#allocation0 + $0x1] ss:$16 sm:%s174_s29]   ;;  %s123_s3 = smov 3  ;;  %v115_v29 = vsel %vm42_vm2, %v113_v24, %v110_v25  ;;  %v180_v30 = vld [vmem:[#allocation0 - $0x37] ss:$16 sm:%s179_s30]   ;;  %s126_s4 = smov 12 }
  0x10   :  { %v124_v31 = vld [vmem:[#allocation0 + $0x3] ss:$16 sm:%s123_s3]   ;;  %s131_s5 = smov 48  ;;  %v177_v32 = vsel %vm32_vm0, %v175_v27, %v172_v26  ;;  %s136_s6 = smov 192  ;;  %v185_v41 = vld [vmem:[#allocation0 - $0x37] ss:$16 sm:%s184_s2]  }
  0x11   :  { %v127_v33 = vld [vmem:[#allocation0 + $0x3] ss:$16 sm:%s126_s4]   ;;  %v132_v34 = vld [vmem:[#allocation0 - $0x35] ss:$16 sm:%s131_s5]   ;;  %s245_s7 = smov 96   ;;  %s147_s0 = smov 3  ;;  %v182_v40 = vsel %vm37_vm1, %v180_v30, %v177_v32 }
  0x12   :  { %v129_v35 = vsel %vm32_vm0, %v127_v33, %v124_v31  ;;  %v137_v36 = vld [vmem:[#allocation0 - $0x35] ss:$16 sm:%s136_s6]   ;;  %s150_s8 = smov 12  ;;  %s246_s9 = smov 64   ;;  %v148_v38 = vld [vmem:[#allocation0 + $0x2] ss:$16 sm:%s147_s0]   ;;  %v187_v45 = vsel %vm42_vm2, %v185_v41, %v182_v40 }
  0x13   :  { %68 = vrot.lane.b32.xlu0 %v67_v28, %s245_s7  ;;  %v134_v37 = vsel %vm37_vm1, %v132_v34, %v129_v35  ;;  %v151_v39 = vld [vmem:[#allocation0 + $0x2] ss:$16 sm:%s150_s8]   ;;  %s155_s10 = smov 48  ;;  %s160_s11 = smov 192  ;;  %vm118_vm8 = vcmask 654848   ;;  %vm142_vm9 = vcmask 523648  }
  0x14   :  { %116 = vrot.lane.b32.xlu1 %v115_v29, %s246_s9  ;;  %v139_v42 = vsel %vm42_vm2, %v137_v36, %v134_v37  ;;  %v153_v43 = vsel %vm32_vm0, %v151_v39, %v148_v38  ;;  %v156_v44 = vld [vmem:[#allocation0 - $0x36] ss:$16 sm:%s155_s10]   ;;  %s247_s12 = smov 48   ;;  %s248_s13 = smov 16   ;;  %vm166_vm10 = vcmask 392448   ;;  %vm190_vm11 = vcmask 261248  }
  0x15   :  { %140 = vrot.lane.b32.xlu2 %v139_v42, %s247_s12  ;;  %v158_v46 = vsel %vm37_vm1, %v156_v44, %v153_v43  ;;  %v161_v47 = vld [vmem:[#allocation0 - $0x36] ss:$16 sm:%s160_s11]   ;;  %s249_s14 = smov 32   ;;  %v14_v49 = vld [vmem:[#allocation0] ss:$8 sm:$0xf]  }
  0x16   :  { %v163_v48 = vsel %vm42_vm2, %v161_v47, %v158_v46  ;;  %v15_v50 = vld [vmem:[#allocation0] ss:$8 sm:$0xf0]  }
  0x17   :  { %v17_v51 = vsel %vm16_vm3, %v15_v50, %v14_v49 }
  0x18   :  { %19 = vst.msk [vmem:[#allocation2] ss:$8 sm:$0x3] %vm18_vm4, %v17_v51  }
  0x19   :  { %21 = vst.msk [vmem:[#allocation2 - $0xf] ss:$8 sm:$0xc] %vm18_vm4, %v17_v51  }
  0x1a   :  { %23 = vst.msk [vmem:[#allocation2 - $0x1e] ss:$8 sm:$0x30] %vm18_vm4, %v17_v51  }
  0x1b   :  { %188 = vrot.lane.b32.xlu0 %v187_v45, %s248_s13  ;;  %25 = vst.msk [vmem:[#allocation2 - $0x2d] ss:$8 sm:$0xc0] %vm18_vm4, %v17_v51  }
  0x1d   :  { %164 = vrot.lane.b32.xlu2 %v163_v48, %s249_s14 }
  0x6f   :  { %v141_v52 = vpop.permute.xlu2 %140  }
  0x77   :  { %v165_v53 = vpop.permute.xlu2 %164  }
  0x7d   :  { %v45_v54 = vpop.permute.xlu0 %44  }
  0x7e   :  { %v93_v55 = vpop.permute.xlu1 %92   ;;  %47 = vst.msk [vmem:[#allocation2] sm:$0xf] %vm46_vm5, %v45_v54  }
  0x7f   :  { %49 = vst.msk [vmem:[#allocation2 + $0x4] sm:$0xf0] %vm46_vm5, %v45_v54  }
  0x85   :  { %v69_v56 = vpop.permute.xlu0 %68  }
  0x86   :  { %71 = vst.msk [vmem:[#allocation2] sm:$0xf] %vm70_vm6, %v69_v56   ;;  %v117_v57 = vpop.permute.xlu1 %116  }
  0x87   :  { %73 = vst.msk [vmem:[#allocation2 + $0x4] sm:$0xf0] %vm70_vm6, %v69_v56  }
  0x88   :  { %95 = vst.msk [vmem:[#allocation2] sm:$0xf] %vm94_vm7, %v93_v55  }
  0x89   :  { %97 = vst.msk [vmem:[#allocation2 + $0x4] sm:$0xf0] %vm94_vm7, %v93_v55  }
  0x8a   :  { %119 = vst.msk [vmem:[#allocation2] sm:$0xf] %vm118_vm8, %v117_v57  }
  0x8b   :  { %121 = vst.msk [vmem:[#allocation2 + $0x4] sm:$0xf0] %vm118_vm8, %v117_v57  }
  0x8c   :  { %143 = vst.msk [vmem:[#allocation2] sm:$0xf] %vm142_vm9, %v141_v52  }
  0x8d   :  { %145 = vst.msk [vmem:[#allocation2 + $0x4] sm:$0xf0] %vm142_vm9, %v141_v52   ;;  %v189_v58 = vpop.permute.xlu0 %188  }
  0x8e   :  { %167 = vst.msk [vmem:[#allocation2] sm:$0xf] %vm166_vm10, %v165_v53  }
  0x8f   :  { %169 = vst.msk [vmem:[#allocation2 + $0x4] sm:$0xf0] %vm166_vm10, %v165_v53  }
  0x90   :  { %191 = vst.msk [vmem:[#allocation2] sm:$0xf] %vm190_vm11, %v189_v58  }
  0x91   :  { %193 = vst.msk [vmem:[#allocation2 + $0x4] sm:$0xf0] %vm190_vm11, %v189_v58  }
  0x97   :  { %v196_v59 = vld [vmem:[#allocation2] sm:$0xf] }
  0x98   :  { %199 = vst [vmem:[%s291_s1] sm:$0xf] %v196_v59  ;;  %v201_v60 = vld [vmem:[#allocation2 + $0x8] sm:$0xf] }
  0x99   :  { %207 = vst [vmem:[%s291_s1 + $0x4] sm:$0xf] %v201_v60 }
  0x9a   :  { %206 = vsyncpa [#allocation1], 1 }

// kernel: sub.13
= control target key start
LH: loop header
LB: loop body
LE: loop exit
PB: predicated region body
PF: predicated region fallthrough
CT: control target
= control target key end

     0   :  { %s7_s6 = smov 3  ;;  %s21_s9 = smov 3  ;;  %vm4_vm0 = vcmask 130048   ;;  %vm11_vm1 = vcmask 1048448   ;;  %vm18_vm2 = vcmask 917248   ;;  %vm25_vm3 = vcmask 786048   ;;  %s119_s0 = inlined_call_operand.vmem [shape: f32[16,16], index: 0, kind: input, shape index: {}]   ;;  %s120_s1 = inlined_call_operand.vmem [shape: f32[256], index: 1, kind: output, shape index: {}]  }
   0x1   :  { %v61_v0 = vld [vmem:[%s119_s0 + $0x7] ss:$8 sm:%s7_s6]   ;;  %s75_s10 = smov 112   ;;  %v63_v1 = vld [vmem:[%s119_s0 + $0x5] ss:$8 sm:%s21_s9]   ;;  %s76_s13 = smov 80  }
   0x2   :  { %9 = vrot.lane.b32.xlu0 %v61_v0, %s75_s10  ;;  %23 = vrot.lane.b32.xlu1 %v63_v1, %s76_s13  ;;  %s14_s14 = smov 3  ;;  %s28_s15 = smov 3  ;;  %vm32_vm4 = vcmask 654848   ;;  %vm39_vm5 = vcmask 523648   ;;  %vm46_vm6 = vcmask 392448   ;;  %vm53_vm7 = vcmask 261248  }
   0x3   :  { %s35_s16 = smov 3  ;;  %v62_v3 = vld [vmem:[%s119_s0 + $0x6] ss:$8 sm:%s14_s14]   ;;  %s77_s21 = smov 48   ;;  %v64_v4 = vld [vmem:[%s119_s0 + $0x4] ss:$8 sm:%s28_s15]  }
   0x4   :  { %v65_v2 = vld [vmem:[%s119_s0 + $0x3] ss:$8 sm:%s35_s16]   ;;  %s42_s24 = smov 3  ;;  %s78_s25 = smov 96  }
   0x5   :  { %37 = vrot.lane.b32.xlu2 %v65_v2, %s77_s21  ;;  %s79_s26 = smov 64   ;;  %s49_s27 = smov 3  ;;  %v66_v5 = vld [vmem:[%s119_s0 + $0x2] ss:$8 sm:%s42_s24]  }
   0x6   :  { %v67_v6 = vld [vmem:[%s119_s0 + $0x1] ss:$8 sm:%s49_s27]   ;;  %s80_s3 = smov 32   ;;  %s81_s4 = smov 16  }
   0x7   :  { %s2_s5 = smov 3 }
   0x8   :  { %v3_v7 = vld [vmem:[%s119_s0] ss:$8 sm:%s2_s5]  }
   0x9   :  { %5 = vst.msk [vmem:[#allocation0] sm:$0x3] %vm4_vm0, %v3_v7  }
   0xa   :  { %16 = vrot.lane.b32.xlu0 %v62_v3, %s78_s25  ;;  %30 = vrot.lane.b32.xlu1 %v64_v4, %s79_s26 }
   0xd   :  { %44 = vrot.lane.b32.xlu2 %v66_v5, %s80_s3 }
  0x12   :  { %51 = vrot.lane.b32.xlu0 %v67_v6, %s81_s4 }
  0x5f   :  { %v38_v8 = vpop.permute.xlu2 %37  }
  0x67   :  { %v45_v9 = vpop.permute.xlu2 %44  }
  0x74   :  { %v10_v10 = vpop.permute.xlu0 %9   ;;  %v24_v11 = vpop.permute.xlu1 %23  }
  0x75   :  { %12 = vst.msk [vmem:[#allocation0] sm:$0x3] %vm11_vm1, %v10_v10  }
  0x7c   :  { %v17_v12 = vpop.permute.xlu0 %16   ;;  %v31_v13 = vpop.permute.xlu1 %30  }
  0x7d   :  { %19 = vst.msk [vmem:[#allocation0] sm:$0x3] %vm18_vm2, %v17_v12  }
  0x7e   :  { %26 = vst.msk [vmem:[#allocation0] sm:$0x3] %vm25_vm3, %v24_v11  }
  0x7f   :  { %33 = vst.msk [vmem:[#allocation0] sm:$0x3] %vm32_vm4, %v31_v13  }
  0x80   :  { %40 = vst.msk [vmem:[#allocation0] sm:$0x3] %vm39_vm5, %v38_v8  }
  0x81   :  { %47 = vst.msk [vmem:[#allocation0] sm:$0x3] %vm46_vm6, %v45_v9  }
  0x84   :  { %v52_v14 = vpop.permute.xlu0 %51  }
  0x85   :  { %54 = vst.msk [vmem:[#allocation0] sm:$0x3] %vm53_vm7, %v52_v14  }
  0x8c   :  { %v57_v15 = vld [vmem:[#allocation0] sm:$0x3] }
  0x8d   :  { %60 = vst [vmem:[%s120_s1] sm:$0x3] %v57_v15 }

// kernel: crfrnn_forward.3
= control target key start
LH: loop header
LB: loop body
LE: loop exit
PB: predicated region body
PF: predicated region fallthrough
CT: control target
= control target key end

     0   :  { %vm204_vm0 = vcmask 1043456   ;;  %vm107_vm1 = vcmask 31744   ;;  %vm527_vm2 = vcmask 1046528   ;;  %vm430_vm3 = vcmask 56320   ;;  %s2745_s1 = inlined_call_operand.vmem [shape: f32[4,256], index: 1, kind: input, shape index: {}]   ;;  %s2746_s0 = inlined_call_operand.vmem [shape: f32[256,4], index: 0, kind: input, shape index: {}]   ;;  %s2747_s3 = inlined_call_operand.vmem [shape: f32[7,256], index: 3, kind: input, shape index: {}]   ;;  %s2748_s2 = inlined_call_operand.vmem [shape: f32[256,7], index: 2, kind: input, shape index: {}]   ;;  %s2749_s4 = inlined_call_operand.vmem [shape: bf16[5,256], index: 4, kind: input, shape index: {}]   ;;  %s2750_s6 = inlined_call_operand.vmem [shape: f32[4,4], index: 6, kind: input, shape index: {}]   ;;  %s2751_s7 = inlined_call_operand.vmem [shape: f32[4,4], index: 7, kind: input, shape index: {}]   ;;  %s2752_s5 = inlined_call_operand.vmem [shape: f32[4,256], index: 5, kind: input, shape index: {}]   ;;  %s2753_s8 = inlined_call_operand.vmem [shape: f32[4,256], index: 8, kind: output, shape index: {}]  }
   0x1   :  { %v106_v0 = vld [vmem:[%s2745_s1] sm:$0xf]  ;;  %v68_v2 = vld [vmem:[%s2746_s0 + $0xf8] sm:$0xff]  ;;  %v1885_v4 = vld [vmem:[%s2746_s0 + $0x8] sm:$0xff] }
   0x2   :  { %v1866_v1 = vld [vmem:[%s2746_s0] sm:$0xff]  ;;  %1393 = vmatpush.msk.msra.mxu0 %vm204_vm0, %v106_v0  ;;  %1538 = vmatpush.msk.msra.mxu3 %vm204_vm0, %v106_v0  ;;  %v1899_v6 = vld [vmem:[%s2746_s0 + $0x10] sm:$0xff]  ;;  %v1904_v7 = vld [vmem:[%s2748_s2 + $0x8] sm:$0xff] }
   0x3   :  { %1394 = vmatmul.msk.f32.vlgmr.msra.gmra.mxu0 %vm107_vm1, %v1866_v1  ;;  %v429_v3 = vld [vmem:[%s2747_s3] sm:$0x7f]  ;;  %1537 = vmatpush.msk.msra.mxu2 %vm204_vm0, %v106_v0  ;;  %v1913_v8 = vld [vmem:[%s2746_s0 + $0x18] sm:$0xff]  ;;  %v1918_v9 = vld [vmem:[%s2748_s2 + $0x10] sm:$0xff] }
   0x4   :  { %1425 = vmatmul.msk.f32.vlgmr.msra.gmra.mxu3 %vm107_vm1, %v68_v2  ;;  %1536 = vmatpush.msk.msra.mxu1 %vm204_vm0, %v106_v0  ;;  %v1890_v5 = vld [vmem:[%s2748_s2] sm:$0xff]  ;;  %v1932_v11 = vld [vmem:[%s2748_s2 + $0x18] sm:$0xff]  ;;  %v1941_v12 = vld [vmem:[%s2746_s0 + $0x28] sm:$0xff] }
   0x5   :  { %1426 = vmatpush.msk.msrb.mxu3 %vm527_vm2, %v429_v3  ;;  %v1927_v10 = vld [vmem:[%s2746_s0 + $0x20] sm:$0xff]  ;;  %v1955_v14 = vld [vmem:[%s2746_s0 + $0x30] sm:$0xff]  ;;  %v1960_v15 = vld [vmem:[%s2748_s2 + $0x28] sm:$0xff] }
   0x6   :  { %v1946_v13 = vld [vmem:[%s2748_s2 + $0x20] sm:$0xff]  ;;  %2781 = vst [vmem:[#allocation4_spill] sm:$0xff] %v1955_v14  ;;  %v1969_v16 = vld [vmem:[%s2746_s0 + $0x38] sm:$0xff]  ;;  %v1974_v17 = vld [vmem:[%s2748_s2 + $0x30] sm:$0xff] }
   0x7   :  { %2782 = vst [vmem:[#allocation5_spill] sm:$0xff] %v1969_v16  ;;  %v1983_v18 = vld [vmem:[%s2746_s0 + $0x40] sm:$0xff]  ;;  %v1988_v19 = vld [vmem:[%s2748_s2 + $0x38] sm:$0xff]  ;;  %v1997_v20 = vld [vmem:[%s2746_s0 + $0x48] sm:$0xff] }
   0x8   :  { %2783 = vst [vmem:[#allocation6_spill] sm:$0xff] %v1983_v18  ;;  %v2002_v21 = vld [vmem:[%s2748_s2 + $0x40] sm:$0xff]  ;;  %v2011_v22 = vld [vmem:[%s2746_s0 + $0x50] sm:$0xff]  ;;  %v2016_v23 = vld [vmem:[%s2748_s2 + $0x48] sm:$0xff] }
   0x9   :  { %2784 = vst [vmem:[#allocation7_spill] sm:$0xff] %v1997_v20  ;;  %v2025_v24 = vld [vmem:[%s2746_s0 + $0x58] sm:$0xff]  ;;  %v2030_v25 = vld [vmem:[%s2748_s2 + $0x50] sm:$0xff]  ;;  %v2039_v26 = vld [vmem:[%s2746_s0 + $0x60] sm:$0xff] }
   0xa   :  { %2785 = vst [vmem:[#allocation8_spill] sm:$0xff] %v2011_v22  ;;  %v2044_v27 = vld [vmem:[%s2748_s2 + $0x58] sm:$0xff]  ;;  %v2053_v28 = vld [vmem:[%s2746_s0 + $0x68] sm:$0xff]  ;;  %v2058_v29 = vld [vmem:[%s2748_s2 + $0x60] sm:$0xff] }
   0xb   :  { %1395 = vmatmul.msk.f32.gmra.mxu0 %vm107_vm1, %v1885_v4  ;;  %2786 = vst [vmem:[#allocation9_spill] sm:$0xff] %v2025_v24  ;;  %v2067_v30 = vld [vmem:[%s2746_s0 + $0x70] sm:$0xff]  ;;  %v2072_v31 = vld [vmem:[%s2748_s2 + $0x68] sm:$0xff]  ;;  %v2081_v32 = vld [vmem:[%s2746_s0 + $0x78] sm:$0xff] }
   0xc   :  { %1427 = vmatmul.msk.f32.vlgmr.msrb.gmra.mxu3 %vm430_vm3, %v1890_v5  ;;  %2787 = vst [vmem:[#allocation10_spill] sm:$0xff] %v2039_v26  ;;  %v60_v33 = vld [vmem:[%s2746_s0 + $0xb8] sm:$0xff]  ;;  %v2089_v34 = vld [vmem:[%s2748_s2 + $0x70] sm:$0xff]  ;;  %v61_v36 = vld [vmem:[%s2746_s0 + $0xc0] sm:$0xff] }
   0xd   :  { %2788 = vst [vmem:[#allocation11_spill] sm:$0xff] %v2053_v28  ;;  %1417 = vmatmul.msk.f32.vlgmr.msra.gmra.mxu2 %vm107_vm1, %v60_v33  ;;  %v2104_v37 = vld [vmem:[%s2748_s2 + $0x78] sm:$0xff]  ;;  %v62_v40 = vld [vmem:[%s2746_s0 + $0xc8] sm:$0xff]  ;;  %v2119_v41 = vld [vmem:[%s2748_s2 + $0x80] sm:$0xff] }
   0xe   :  { %2789 = vst [vmem:[#allocation12_spill] sm:$0xff] %v2067_v30  ;;  %v63_v44 = vld [vmem:[%s2746_s0 + $0xd0] sm:$0xff]  ;;  %v2134_v45 = vld [vmem:[%s2748_s2 + $0x88] sm:$0xff]  ;;  %v64_v48 = vld [vmem:[%s2746_s0 + $0xd8] sm:$0xff] }
   0xf   :  { %2790 = vst [vmem:[#allocation13_spill] sm:$0xff] %v2081_v32  ;;  %v2149_v49 = vld [vmem:[%s2748_s2 + $0x90] sm:$0xff]  ;;  %v65_v52 = vld [vmem:[%s2746_s0 + $0xe0] sm:$0xff]  ;;  %v2164_v53 = vld [vmem:[%s2748_s2 + $0x98] sm:$0xff] }
  0x10   :  { %v66_v56 = vld [vmem:[%s2746_s0 + $0xe8] sm:$0xff]  ;;  %v2179_v57 = vld [vmem:[%s2748_s2 + $0xa0] sm:$0xff]  ;;  %v67_v61 = vld [vmem:[%s2746_s0 + $0xf0] sm:$0xff] }
  0x11   :  { %v2191_v60 = vld [vmem:[%s2746_s0 + $0x88] sm:$0xff]  ;;  %v2213_v2 = vld [vmem:[%s2746_s0 + $0x90] sm:$0xff] }
  0x12   :  { %2791 = vst [vmem:[#allocation14_spill] sm:$0xff] %v2191_v60  ;;  %v2199_v62 = vld [vmem:[%s2748_s2 + $0xa8] sm:$0xff]  ;;  %1411 = vmatmul.msk.f32.vlgmr.msra.gmra.mxu1 %vm107_vm1, %v2191_v60  ;;  %v2218_v3 = vld [vmem:[%s2748_s2 + $0xb0] sm:$0xff] }
  0x13   :  { %1396 = vmatmul.msk.f32.gmra.mxu0 %vm107_vm1, %v1899_v6  ;;  %2792 = vst [vmem:[#allocation15_spill] sm:$0xff] %v2199_v62 }
  0x14   :  { %1428 = vmatmul.msk.f32.gmra.mxu3 %vm430_vm3, %v1904_v7  ;;  %2793 = vst [vmem:[#allocation16_spill] sm:$0xff] %v2213_v2 }
  0x15   :  { %1418 = vmatmul.msk.f32.gmra.mxu2 %vm107_vm1, %v61_v36  ;;  %2794 = vst [vmem:[#allocation17_spill] sm:$0xff] %v2218_v3 }
  0x1a   :  { %1412 = vmatmul.msk.f32.gmra.mxu1 %vm107_vm1, %v2213_v2 }
  0x1b   :  { %1397 = vmatmul.msk.f32.gmra.mxu0 %vm107_vm1, %v1913_v8 }
  0x1c   :  { %1429 = vmatmul.msk.f32.gmra.mxu3 %vm430_vm3, %v1918_v9 }
  0x1d   :  { %1419 = vmatmul.msk.f32.gmra.mxu2 %vm107_vm1, %v62_v40  ;;  %v2231_v40 = vld [vmem:[%s2746_s0 + $0x98] sm:$0xff] }
  0x1e   :  { %2795 = vst [vmem:[#allocation18_spill] sm:$0xff] %v2231_v40 }
  0x22   :  { %1413 = vmatmul.msk.f32.gmra.mxu1 %vm107_vm1, %v2231_v40  ;;  %v2261_v40 = vld [vmem:[%s2746_s0 + $0x80] sm:$0xff] }
  0x23   :  { %1398 = vmatmul.msk.f32.gmra.mxu0 %vm107_vm1, %v1927_v10  ;;  %2799 = vst [vmem:[#allocation22_spill] sm:$0xff] %v2261_v40 }
  0x24   :  { %1430 = vmatmul.msk.f32.gmra.mxu3 %vm430_vm3, %v1932_v11 }
  0x25   :  { %1420 = vmatmul.msk.f32.gmra.mxu2 %vm107_vm1, %v63_v44  ;;  %v2236_v44 = vld [vmem:[%s2748_s2 + $0xb8] sm:$0xff] }
  0x26   :  { %2796 = vst [vmem:[#allocation19_spill] sm:$0xff] %v2236_v44 }
  0x2b   :  { %1399 = vmatmul.msk.f32.gmra.mxu0 %vm107_vm1, %v1941_v12 }
  0x2c   :  { %1431 = vmatmul.msk.f32.gmra.mxu3 %vm430_vm3, %v1946_v13 }
  0x2d   :  { %1421 = vmatmul.msk.f32.gmra.mxu2 %vm107_vm1, %v64_v48 }
  0x33   :  { %1400 = vmatmul.msk.f32.gmra.mxu0 %vm107_vm1, %v1955_v14 }
  0x34   :  { %1432 = vmatmul.msk.f32.gmra.mxu3 %vm430_vm3, %v1960_v15 }
  0x35   :  { %1422 = vmatmul.msk.f32.gmra.mxu2 %vm107_vm1, %v65_v52 }
  0x3b   :  { %1401 = vmatmul.msk.f32.gmra.mxu0 %vm107_vm1, %v1969_v16 }
  0x3c   :  { %1433 = vmatmul.msk.f32.gmra.mxu3 %vm430_vm3, %v1974_v17 }
  0x3d   :  { %1423 = vmatmul.msk.f32.gmra.mxu2 %vm107_vm1, %v66_v56  ;;  %v2249_v56 = vld [vmem:[%s2746_s0 + $0xa0] sm:$0xff] }
  0x3e   :  { %2797 = vst [vmem:[#allocation20_spill] sm:$0xff] %v2249_v56  ;;  %1414 = vmatmul.msk.f32.gmra.mxu1 %vm107_vm1, %v2249_v56  ;;  %v2277_v56 = vld [vmem:[%s2748_s2 + $0xc8] sm:$0xff] }
  0x3f   :  { %2801 = vst [vmem:[#allocation24_spill] sm:$0xff] %v2277_v56 }
  0x43   :  { %1402 = vmatmul.msk.f32.gmra.mxu0 %vm107_vm1, %v1983_v18 }
  0x44   :  { %1434 = vmatmul.msk.f32.gmra.mxu3 %vm430_vm3, %v1988_v19 }
  0x45   :  { %1424 = vmatmul.msk.f32.gmra.mxu2 %vm107_vm1, %v67_v61  ;;  %v2254_v61 = vld [vmem:[%s2748_s2 + $0xc0] sm:$0xff] }
  0x46   :  { %2798 = vst [vmem:[#allocation21_spill] sm:$0xff] %v2254_v61 }
  0x4b   :  { %1403 = vmatmul.msk.f32.gmra.mxu0 %vm107_vm1, %v1997_v20 }
  0x4c   :  { %1435 = vmatmul.msk.f32.gmra.mxu3 %vm430_vm3, %v2002_v21 }
  0x53   :  { %1404 = vmatmul.msk.f32.gmra.mxu0 %vm107_vm1, %v2011_v22  ;;  %v2315_v22 = vld [vmem:[%s2748_s2 + $0xd8] sm:$0xff] }
  0x54   :  { %1436 = vmatmul.msk.f32.gmra.mxu3 %vm430_vm3, %v2016_v23  ;;  %2804 = vst [vmem:[#allocation27_spill] sm:$0xff] %v2315_v22 }
  0x5b   :  { %1405 = vmatmul.msk.f32.gmra.mxu0 %vm107_vm1, %v2025_v24 }
  0x5c   :  { %1437 = vmatmul.msk.f32.gmra.mxu3 %vm430_vm3, %v2030_v25 }
  0x63   :  { %1406 = vmatmul.msk.f32.gmra.mxu0 %vm107_vm1, %v2039_v26  ;;  %v2297_v26 = vld [vmem:[%s2746_s0 + $0xb0] sm:$0xff] }
  0x64   :  { %1438 = vmatmul.msk.f32.gmra.mxu3 %vm430_vm3, %v2044_v27  ;;  %2802 = vst [vmem:[#allocation25_spill] sm:$0xff] %v2297_v26 }
  0x6b   :  { %1407 = vmatmul.msk.f32.gmra.mxu0 %vm107_vm1, %v2053_v28 }
  0x6c   :  { %1439 = vmatmul.msk.f32.gmra.mxu3 %vm430_vm3, %v2058_v29 }
  0x73   :  { %1408 = vmatmul.msk.f32.gmra.mxu0 %vm107_vm1, %v2067_v30  ;;  %v2282_v30 = vld [vmem:[%s2747_s3 + $0x8] sm:$0x7f] }
  0x74   :  { %1440 = vmatmul.msk.f32.gmra.mxu3 %vm430_vm3, %v2072_v31  ;;  %1495 = vmatpush.msk.msrb.mxu0 %vm527_vm2, %v2282_v30 }
  0x7b   :  { %1409 = vmatmul.msk.f32.gmra.mxu0 %vm107_vm1, %v2081_v32  ;;  %v2272_v32 = vld [vmem:[%s2746_s0 + $0xa8] sm:$0xff] }
  0x7c   :  { %1441 = vmatmul.msk.f32.gmra.mxu3 %vm430_vm3, %v2089_v34  ;;  %2800 = vst [vmem:[#allocation23_spill] sm:$0xff] %v2272_v32  ;;  %1415 = vmatmul.msk.f32.gmra.mxu1 %vm107_vm1, %v2272_v32  ;;  %v2302_v32 = vld [vmem:[%s2748_s2 + $0xd0] sm:$0xff] }
  0x7d   :  { %2803 = vst [vmem:[#allocation26_spill] sm:$0xff] %v2302_v32 }
  0x80   :  { %v2096_v35 = vpop.f32.mrf.mxu0 }
  0x83   :  { %1410 = vmatmul.msk.f32.gmra.mxu0 %vm107_vm1, %v2261_v40 }
  0x84   :  { %1442 = vmatmul.msk.f32.gmra.mxu3 %vm430_vm3, %v2104_v37  ;;  %1416 = vmatmul.msk.f32.gmra.mxu1 %vm107_vm1, %v2297_v26 }
  0x87   :  { %v2109_v38 = vpop.f32.mrf.mxu3 }
  0x88   :  { %v2111_v39 = vpop.f32.mrf.mxu0 }
  0x8b   :  { %1496 = vmatmul.msk.f32.vlgmr.msrb.gmra.mxu0 %vm430_vm3, %v1890_v5 }
  0x8c   :  { %1443 = vmatmul.msk.f32.gmra.mxu3 %vm430_vm3, %v2119_v41 }
  0x8f   :  { %v2124_v42 = vpop.f32.mrf.mxu3 }
  0x90   :  { %v2126_v43 = vpop.f32.mrf.mxu0 }
  0x93   :  { %1497 = vmatmul.msk.f32.gmra.mxu0 %vm430_vm3, %v1904_v7  ;;  %v2324_v7 = vld [vmem:[%s2748_s2 + $0xe0] sm:$0xff] }
  0x94   :  { %1444 = vmatmul.msk.f32.gmra.mxu3 %vm430_vm3, %v2134_v45  ;;  %2805 = vst [vmem:[#allocation28_spill] sm:$0xff] %v2324_v7 }
  0x97   :  { %v2139_v46 = vpop.f32.mrf.mxu3 }
  0x98   :  { %v2141_v47 = vpop.f32.mrf.mxu0 }
  0x9b   :  { %1498 = vmatmul.msk.f32.gmra.mxu0 %vm430_vm3, %v1918_v9 }
  0x9c   :  { %1445 = vmatmul.msk.f32.gmra.mxu3 %vm430_vm3, %v2149_v49 }
  0x9f   :  { %v2154_v50 = vpop.f32.mrf.mxu3 }
  0xa0   :  { %v2156_v51 = vpop.f32.mrf.mxu0 }
  0xa3   :  { %1499 = vmatmul.msk.f32.gmra.mxu0 %vm430_vm3, %v1932_v11  ;;  %v2342_v11 = vld [vmem:[%s2748_s2 + $0xf0] sm:$0xff] }
  0xa4   :  { %1446 = vmatmul.msk.f32.gmra.mxu3 %vm430_vm3, %v2164_v53  ;;  %2807 = vst [vmem:[#allocation30_spill] sm:$0xff] %v2342_v11 }
  0xa7   :  { %v2169_v54 = vpop.f32.mrf.mxu3 }
  0xa8   :  { %v2171_v55 = vpop.f32.mrf.mxu0 }
  0xab   :  { %1500 = vmatmul.msk.f32.gmra.mxu0 %vm430_vm3, %v1946_v13 }
  0xac   :  { %1447 = vmatmul.msk.f32.gmra.mxu3 %vm430_vm3, %v2179_v57 }
  0xaf   :  { %v2184_v58 = vpop.f32.mrf.mxu3 }
  0xb0   :  { %v2186_v59 = vpop.f32.mrf.mxu0 }
  0xb3   :  { %1501 = vmatmul.msk.f32.gmra.mxu0 %vm430_vm3, %v1960_v15 }
  0xb4   :  { %1448 = vmatmul.msk.f32.gmra.mxu3 %vm430_vm3, %v2199_v62 }
  0xb7   :  { %v2206_v63 = vpop.f32.mrf.mxu3 }
  0xb8   :  { %v2208_v0 = vpop.f32.mrf.mxu0 }
  0xbb   :  { %1502 = vmatmul.msk.f32.gmra.mxu0 %vm430_vm3, %v1974_v17 }
  0xbc   :  { %1449 = vmatmul.msk.f32.gmra.mxu3 %vm430_vm3, %v2218_v3  ;;  %v2353_v3 = vld [vmem:[%s2748_s2 + $0xf8] sm:$0xff] }
  0xbf   :  { %v2224_v33 = vpop.f32.mrf.mxu3 }
  0xc0   :  { %v2226_v36 = vpop.f32.mrf.mxu0 }
  0xc3   :  { %1503 = vmatmul.msk.f32.gmra.mxu0 %vm430_vm3, %v1988_v19 }
  0xc4   :  { %1450 = vmatmul.msk.f32.gmra.mxu3 %vm430_vm3, %v2236_v44  ;;  %v2348_v44 = vpop.f32.mrf.mxu2 }
  0xc7   :  { %v2242_v48 = vpop.f32.mrf.mxu3 }
  0xc8   :  { %v2244_v52 = vpop.f32.mrf.mxu0 }
  0xcb   :  { %1504 = vmatmul.msk.f32.gmra.mxu0 %vm430_vm3, %v2002_v21 }
  0xcc   :  { %1451 = vmatmul.msk.f32.gmra.mxu3 %vm430_vm3, %v2254_v61 }
  0xcf   :  { %v2267_v2 = vpop.f32.mrf.mxu3 }
  0xd0   :  { %v255_v60 = vpop.f32.mrf.mxu0 }
  0xd3   :  { %1505 = vmatmul.msk.f32.gmra.mxu0 %vm430_vm3, %v2016_v23  ;;  %v327_v23 = vmul.f32 1.442695, %v2141_v47 }
  0xd4   :  { %1452 = vmatmul.msk.f32.gmra.mxu3 %vm430_vm3, %v2277_v56 }
  0xd7   :  { %v2292_v40 = vpop.f32.mrf.mxu3 }
  0xd8   :  { %v258_v28 = vpop.f32.mrf.mxu0 }
  0xd9   :  { %v343_v15 = vmul.f32 1.442695, %v258_v28  ;;  %v339_v28 = vmul.f32 1.442695, %v2244_v52 }
  0xdb   :  { %1506 = vmatmul.msk.f32.gmra.mxu0 %vm430_vm3, %v2030_v25  ;;  %v648_v25 = vmul.f32 1.442695, %v2154_v50 }
  0xdc   :  { %1453 = vmatmul.msk.f32.gmra.mxu3 %vm430_vm3, %v2302_v32 }
  0xdf   :  { %v2310_v5 = vpop.f32.mrf.mxu3 }
  0xe0   :  { %v261_v24 = vpop.f32.mrf.mxu0 }
  0xe1   :  { %v345_v13 = vmul.f32 1.442695, %v261_v24  ;;  %v2359_v24 = vpop.f32.mrf.mxu2 }
  0xe3   :  { %1507 = vmatmul.msk.f32.gmra.mxu0 %vm430_vm3, %v2044_v27  ;;  %v383_v27 = vmul.f32 1.442695, %v2109_v38 }
  0xe4   :  { %1454 = vmatmul.msk.f32.gmra.mxu3 %vm430_vm3, %v2315_v22  ;;  %v2333_v22 = vld [vmem:[%s2748_s2 + $0xe8] sm:$0xff] }
  0xe5   :  { %2806 = vst [vmem:[#allocation29_spill] sm:$0xff] %v2333_v22 }
  0xe7   :  { %v581_v26 = vpop.f32.mrf.mxu3 }
  0xe8   :  { %v264_v56 = vpop.f32.mrf.mxu0  ;;  %v666_v52 = vmul.f32 1.442695, %v581_v26 }
  0xeb   :  { %1508 = vmatmul.msk.f32.gmra.mxu0 %vm430_vm3, %v2058_v29 }
  0xec   :  { %1455 = vmatmul.msk.f32.gmra.mxu3 %vm430_vm3, %v2324_v7 }
  0xef   :  { %v584_v32 = vpop.f32.mrf.mxu3 }
  0xf0   :  { %v267_v20 = vpop.f32.mrf.mxu0 }
  0xf1   :  { %v349_v9 = vmul.f32 1.442695, %v267_v20 }
  0xf3   :  { %1541 = vpow2.f32 %v349_v9  ;;  %1509 = vmatmul.msk.f32.gmra.mxu0 %vm430_vm3, %v2072_v31 }
  0xf4   :  { %1456 = vmatmul.msk.f32.gmra.mxu3 %vm430_vm3, %v2333_v22  ;;  %v347_v22 = vmul.f32 1.442695, %v264_v56 }
  0xf7   :  { %v587_v61 = vpop.f32.mrf.mxu3 }
  0xf8   :  { %v270_v18 = vpop.f32.mrf.mxu0 }
  0xf9   :  { %v351_v7 = vmul.f32 1.442695, %v270_v18  ;;  %v1542_v16 = vpop.eup %1541 }
  0xfb   :  { %1543 = vpow2.f32 %v351_v7  ;;  %1510 = vmatmul.msk.f32.gmra.mxu0 %vm430_vm3, %v2089_v34 }
  0xfc   :  { %1457 = vmatmul.msk.f32.gmra.mxu3 %vm430_vm3, %v2342_v11  ;;  %1545 = vpow2.f32 %v347_v22  ;;  %v341_v22 = vmul.f32 1.442695, %v255_v60  ;;  %v2364_v60 = vpop.f32.mrf.mxu2 }
  0xfd   :  { %1547 = vpow2.f32 %v345_v13 }
  0xff   :  { %v590_v20 = vpop.f32.mrf.mxu3 }
 0x100   :  { %v672_v9 = vmul.f32 1.442695, %v590_v20 }
 0x101   :  { %v1544_v18 = vpop.eup %1543 }
 0x102   :  { %v392_v7 = vpack.c.bf16 %v1544_v18, %v1542_v16  ;;  %v1546_v56 = vpop.eup %1545  ;;  %1549 = vpow2.f32 %v672_v9  ;;  %v668_v16 = vmul.f32 1.442695, %v584_v32  ;;  %v670_v18 = vmul.f32 1.442695, %v587_v61 }
 0x103   :  { %v1548_v62 = vpop.eup %1547  ;;  %1551 = vpow2.f32 %v343_v15  ;;  %1511 = vmatmul.msk.f32.gmra.mxu0 %vm430_vm3, %v2104_v37 }
 0x104   :  { %401 = vmatpush.bf16.xpose.msrb.mxu1 %v392_v7  ;;  %1458 = vmatmul.msk.f32.gmra.mxu3 %vm430_vm3, %v2353_v3  ;;  %v391_v13 = vpack.c.bf16 %v1546_v56, %v1548_v62  ;;  %v335_v56 = vmul.f32 1.442695, %v2208_v0 }
 0x107   :  { %v593_v11 = vpop.f32.mrf.mxu3 }
 0x108   :  { %v674_v14 = vmul.f32 1.442695, %v593_v11  ;;  %v1550_v17 = vpop.eup %1549  ;;  %v337_v11 = vmul.f32 1.442695, %v2226_v36  ;;  %v658_v36 = vmul.f32 1.442695, %v2242_v48 }
 0x109   :  { %v1552_v20 = vpop.eup %1551 }
 0x10a   :  { %1553 = vpow2.f32 %v674_v14  ;;  %v664_v14 = vmul.f32 1.442695, %v2310_v5  ;;  %v2375_v5 = vpop.f32.mrf.mxu2 }
 0x10b   :  { %1555 = vpow2.f32 %v341_v22  ;;  %v656_v22 = vmul.f32 1.442695, %v2224_v33  ;;  %v660_v33 = vmul.f32 1.442695, %v2267_v2  ;;  %v373_v31 = vmul.f32 1.442695, %v2375_v5  ;;  %1512 = vmatmul.msk.f32.gmra.mxu0 %vm430_vm3, %v2119_v41 }
 0x10c   :  { %402 = vmatpush.bf16.xpose.msrb.mxu1 %v391_v13  ;;  %1557 = vpow2.f32 %v668_v16  ;;  %v333_v16 = vmul.f32 1.442695, %v2186_v59  ;;  %v369_v5 = vmul.f32 1.442695, %v2359_v24  ;;  %v367_v24 = vmul.f32 1.442695, %v2348_v44 }
 0x10d   :  { %1559 = vpow2.f32 %v670_v18 }
 0x10e   :  { %1561 = vpow2.f32 %v339_v28  ;;  %v662_v28 = vmul.f32 1.442695, %v2292_v40 }
 0x10f   :  { %v2367_v7 = vpop.f32.mrf.mxu3  ;;  %1563 = vpow2.f32 %v337_v11 }
 0x110   :  { %v1554_v32 = vpop.eup %1553  ;;  %1565 = vpow2.f32 %v664_v14 }
 0x111   :  { %v1556_v62 = vpop.eup %1555  ;;  %v715_v61 = vpack.c.bf16 %v1554_v32, %v1550_v17  ;;  %1567 = vpow2.f32 %v666_v52  ;;  %v329_v32 = vmul.f32 1.442695, %v2156_v51  ;;  %v654_v51 = vmul.f32 1.442695, %v2206_v63 }
 0x112   :  { %v390_v9 = vpack.c.bf16 %v1552_v20, %v1556_v62  ;;  %v1558_v15 = vpop.eup %1557  ;;  %1569 = vpow2.f32 %v335_v56  ;;  %v331_v20 = vmul.f32 1.442695, %v2171_v55  ;;  %v2385_v11 = vpop.f32.mrf.mxu2 }
 0x113   :  { %724 = vmatpush.bf16.xpose.msra.mxu3 %v715_v61  ;;  %v1560_v19 = vpop.eup %1559  ;;  %1571 = vpow2.f32 %v656_v22  ;;  %1513 = vmatmul.msk.f32.gmra.mxu0 %vm430_vm3, %v2134_v45 }
 0x114   :  { %403 = vmatpush.bf16.xpose.msrb.mxu1 %v390_v9  ;;  %v1562_v26 = vpop.eup %1561  ;;  %v714_v18 = vpack.c.bf16 %v1560_v19, %v1558_v15  ;;  %1573 = vpow2.f32 %v658_v36  ;;  %v652_v19 = vmul.f32 1.442695, %v2184_v58  ;;  %v325_v36 = vmul.f32 1.442695, %v2126_v43 }
 0x115   :  { %v1564_v0 = vpop.eup %1563  ;;  %1575 = vpow2.f32 %v333_v16  ;;  %v323_v58 = vmul.f32 1.442695, %v2111_v39  ;;  %v650_v43 = vmul.f32 1.442695, %v2169_v54  ;;  %v644_v54 = vmul.f32 1.442695, %v2124_v42 }
 0x116   :  { %v389_v21 = vpack.c.bf16 %v1562_v26, %v1564_v0  ;;  %v1566_v17 = vpop.eup %1565  ;;  %1577 = vpow2.f32 %v660_v33  ;;  %v1460_v42 = vld [vmem:[%s2745_s1 + $0x4] sm:$0xf] }
 0x117   :  { %v2378_v13 = vpop.f32.mrf.mxu3  ;;  %v1568_v48 = vpop.eup %1567  ;;  %1579 = vpow2.f32 %v662_v28  ;;  %v321_v28 = vmul.f32 1.442695, %v2096_v35 }
 0x118   :  { %v1570_v59 = vpop.eup %1569  ;;  %v713_v62 = vpack.c.bf16 %v1568_v48, %v1566_v17  ;;  %1581 = vpow2.f32 %v331_v20  ;;  %v2406_v48 = vpop.f32.mrf.mxu1 }
 0x119   :  { %v1572_v2 = vpop.eup %1571  ;;  %1583 = vpow2.f32 %v329_v32 }
 0x11a   :  { %v1574_v14 = vpop.eup %1573  ;;  %v309_v56 = vpop.f32.mrf.mxu2  ;;  %1585 = vpow2.f32 %v327_v23 }
 0x11b   :  { %725 = vmatpush.bf16.xpose.msra.mxu3 %v714_v18  ;;  %v1576_v61 = vpop.eup %1575  ;;  %v711_v55 = vpack.c.bf16 %v1574_v14, %v1572_v2  ;;  %1587 = vpow2.f32 %v652_v19  ;;  %1514 = vmatmul.msk.f32.gmra.mxu0 %vm430_vm3, %v2149_v49 }
 0x11c   :  { %404 = vmatpush.bf16.xpose.msrb.mxu1 %v389_v21  ;;  %v388_v52 = vpack.c.bf16 %v1570_v59, %v1576_v61  ;;  %v1578_v9 = vpop.eup %1577  ;;  %1589 = vpow2.f32 %v654_v51  ;;  %v646_v59 = vmul.f32 1.442695, %v2139_v46 }
 0x11d   :  { %v1580_v15 = vpop.eup %1579  ;;  %1591 = vpow2.f32 %v325_v36  ;;  %v2428_v36 = vld [vmem:[%s2749_s4] sm:$0x7] }
 0x11e   :  { %v1582_v22 = vpop.eup %1581  ;;  %v712_v16 = vpack.c.bf16 %v1580_v15, %v1578_v9  ;;  %1593 = vpow2.f32 %v323_v58  ;;  %v377_v9 = vmul.f32 1.442695, %v309_v56 }
 0x11f   :  { %v2388_v40 = vpop.f32.mrf.mxu3  ;;  %v1584_v18 = vpop.eup %1583  ;;  %1595 = vpow2.f32 %v648_v25 }
 0x120   :  { %v387_v47 = vpack.c.bf16 %v1582_v22, %v1584_v18  ;;  %v1586_v63 = vpop.eup %1585  ;;  %1597 = vpow2.f32 %v650_v43  ;;  %v2415_v38 = vpop.f32.mrf.mxu1 }
 0x121   :  { %v1588_v33 = vpop.eup %1587  ;;  %1599 = vpow2.f32 %v321_v28 }
 0x122   :  { %v312_v0 = vpop.f32.mrf.mxu2  ;;  %v1590_v17 = vpop.eup %1589  ;;  %1601 = vpow2.f32 %v383_v27 }
 0x123   :  { %726 = vmatpush.bf16.xpose.msra.mxu3 %v713_v62  ;;  %v1592_v39 = vpop.eup %1591  ;;  %v710_v20 = vpack.c.bf16 %v1590_v17, %v1588_v33  ;;  %1603 = vpow2.f32 %v644_v54  ;;  %v379_v15 = vmul.f32 1.442695, %v312_v0  ;;  %v273_v0 = vpop.f32.mrf.mxu0  ;;  %1515 = vmatmul.msk.f32.gmra.mxu0 %vm430_vm3, %v2164_v53 }
 0x124   :  { %405 = vmatpush.bf16.xpose.msrb.mxu1 %v388_v52  ;;  %v386_v50 = vpack.c.bf16 %v1586_v63, %v1592_v39  ;;  %v1594_v35 = vpop.eup %1593 }
 0x125   :  { %v1596_v32 = vpop.eup %1595 }
 0x126   :  { %v1598_v61 = vpop.eup %1597 }
 0x127   :  { %v2396_v26 = vpop.f32.mrf.mxu3  ;;  %v1600_v52 = vpop.eup %1599  ;;  %v709_v46 = vpack.c.bf16 %v1598_v61, %v1596_v32 }
 0x128   :  { %v385_v29 = vpack.c.bf16 %v1594_v35, %v1600_v52 }
 0x12a   :  { %v315_v2 = vpop.f32.mrf.mxu2 }
 0x12b   :  { %727 = vmatpush.bf16.xpose.msra.mxu3 %v712_v16  ;;  %v381_v62 = vmul.f32 1.442695, %v315_v2  ;;  %v282_v16 = vpop.f32.mrf.mxu1  ;;  %v2445_v39 = vpop.f32.mrf.mxu0  ;;  %1516 = vmatmul.msk.f32.gmra.mxu0 %vm430_vm3, %v2179_v57 }
 0x12c   :  { %406 = vmatpush.bf16.xpose.msrb.mxu1 %v387_v47  ;;  %v375_v47 = vmul.f32 1.442695, %v2385_v11  ;;  %v359_v52 = vmul.f32 1.442695, %v282_v16 }
 0x12d   :  { %1605 = vpow2.f32 %v381_v62 }
 0x12e   :  { %1607 = vpow2.f32 %v646_v59 }
 0x12f   :  { %v2404_v21 = vpop.f32.mrf.mxu3  ;;  %1609 = vpow2.f32 %v377_v9 }
 0x130   :  { %1611 = vpow2.f32 %v379_v15 }
 0x131   :  { %1613 = vpow2.f32 %v373_v31 }
 0x132   :  { %1615 = vpow2.f32 %v375_v47  ;;  %v2810_v47 = vld [vmem:[#allocation17_spill] sm:$0xff] }
 0x133   :  { %728 = vmatpush.bf16.xpose.msra.mxu3 %v711_v55  ;;  %v1602_v55 = vpop.eup %1601  ;;  %v285_v43 = vpop.f32.mrf.mxu1  ;;  %1617 = vpow2.f32 %v369_v5  ;;  %v2812_v5 = vld [vmem:[#allocation19_spill] sm:$0xff] }
 0x134   :  { %407 = vmatpush.bf16.xpose.msrb.mxu1 %v386_v50  ;;  %v1604_v23 = vpop.eup %1603  ;;  %v2455_v35 = vpop.f32.mrf.mxu0 }
 0x135   :  { %v1606_v19 = vpop.eup %1605 }
 0x136   :  { %v1608_v22 = vpop.eup %1607  ;;  %v400_v56 = vpack.c.bf16 %v1602_v55, %v1606_v19 }
 0x137   :  { %v2413_v14 = vpop.f32.mrf.mxu3  ;;  %v708_v18 = vpack.c.bf16 %v1608_v22, %v1604_v23  ;;  %v1610_v58 = vpop.eup %1609 }
 0x138   :  { %414 = vmatpush.bf16.xpose.msrb.mxu2 %v400_v56  ;;  %v1612_v25 = vpop.eup %1611  ;;  %v2808_v56 = vld [vmem:[#allocation15_spill] sm:$0xff] }
 0x139   :  { %v399_v33 = vpack.c.bf16 %v1612_v25, %v1610_v58  ;;  %v1614_v11 = vpop.eup %1613  ;;  %1517 = vmatmul.msk.f32.gmra.mxu0 %vm430_vm3, %v2808_v56 }
 0x13a   :  { %v1616_v34 = vpop.eup %1615 }
 0x13b   :  { %729 = vmatpush.bf16.xpose.msra.mxu3 %v710_v20  ;;  %v288_v17 = vpop.f32.mrf.mxu1  ;;  %v398_v50 = vpack.c.bf16 %v1616_v34, %v1614_v11  ;;  %v1618_v37 = vpop.eup %1617 }
 0x13c   :  { %408 = vmatpush.bf16.xpose.msrb.mxu1 %v385_v29  ;;  %v363_v44 = vmul.f32 1.442695, %v288_v17  ;;  %v2461_v62 = vpop.f32.mrf.mxu0 }
 0x13f   :  { %v2423_v51 = vpop.f32.mrf.mxu3 }
 0x140   :  { %415 = vmatpush.bf16.xpose.msrb.mxu2 %v399_v33  ;;  %v2811_v33 = vld [vmem:[#allocation5_spill] sm:$0xff] }
 0x141   :  { %1518 = vmatmul.msk.f32.gmra.mxu0 %vm430_vm3, %v2810_v47 }
 0x143   :  { %409 = vmatmul.bf16.vlgmr.msrb.gmra.mxu1 %v2428_v36  ;;  %730 = vmatpush.bf16.xpose.msra.mxu3 %v709_v46  ;;  %v291_v20 = vpop.f32.mrf.mxu1 }
 0x144   :  { %1461 = vmatpush.msk.msra.mxu1 %vm204_vm0, %v1460_v42  ;;  %v365_v54 = vmul.f32 1.442695, %v291_v20  ;;  %v2468_v46 = vpop.f32.mrf.mxu0 }
 0x146   :  { %1539 = vmatpush.msk.msrb.mxu1 %vm527_vm2, %v2282_v30  ;;  %v371_v30 = vmul.f32 1.442695, %v2364_v60 }
 0x147   :  { %v2437_v63 = vpop.f32.mrf.mxu3 }
 0x148   :  { %1619 = vpow2.f32 %v371_v30  ;;  %416 = vmatpush.bf16.xpose.msrb.mxu2 %v398_v50 }
 0x149   :  { %1621 = vpow2.f32 %v367_v24  ;;  %1519 = vmatmul.msk.f32.gmra.mxu0 %vm430_vm3, %v2812_v5 }
 0x14a   :  { %1623 = vpow2.f32 %v365_v54  ;;  %v2814_v54 = vld [vmem:[#allocation21_spill] sm:$0xff] }
 0x14b   :  { %731 = vmatpush.bf16.xpose.msra.mxu3 %v708_v18 }
 0x14c   :  { %v2475_v23 = vpop.f32.mrf.mxu0 }
 0x14e   :  { %v1620_v60 = vpop.eup %1619 }
 0x14f   :  { %v2443_v28 = vpop.f32.mrf.mxu3  ;;  %v397_v59 = vpack.c.bf16 %v1620_v60, %v1618_v37  ;;  %v1622_v41 = vpop.eup %1621  ;;  %v2813_v60 = vld [vmem:[#allocation6_spill] sm:$0xff] }
 0x150   :  { %v1624_v32 = vpop.eup %1623 }
 0x151   :  { %417 = vmatpush.bf16.xpose.msrb.mxu2 %v397_v59  ;;  %v396_v61 = vpack.c.bf16 %v1622_v41, %v1624_v32  ;;  %1520 = vmatmul.msk.f32.gmra.mxu0 %vm430_vm3, %v2814_v54  ;;  %v2815_v32 = vld [vmem:[#allocation7_spill] sm:$0xff] }
 0x152   :  { %732 = vmatmul.bf16.vlgmr.msra.gmra.mxu3 %v2428_v36 }
 0x153   :  { %1462 = vmatmul.msk.f32.vlgmr.msra.gmra.mxu1 %vm107_vm1, %v1866_v1  ;;  %v361_v1 = vmul.f32 1.442695, %v285_v43 }
 0x154   :  { %v2481_v16 = vpop.f32.mrf.mxu0 }
 0x155   :  { %1625 = vpow2.f32 %v361_v1  ;;  %v1814_v1 = vmov 0.0  }
 0x156   :  { %1627 = vpow2.f32 %v363_v44  ;;  %33 = vst [vmem:[#allocation2] sm:$0x1f] %v1814_v1  ;;  %v692_v44 = vmul.f32 1.442695, %v2443_v28  ;;  %v688_v28 = vmul.f32 1.442695, %v2423_v51 }
 0x157   :  { %v2453_v27 = vpop.f32.mrf.mxu3  ;;  %34 = vst [vmem:[#allocation2 + $0x8] sm:$0x1f] %v1814_v1  ;;  %v686_v51 = vmul.f32 1.442695, %v2413_v14 }
 0x158   :  { %35 = vst [vmem:[#allocation3 + $0x8] sm:$0x1f] %v1814_v1 }
 0x159   :  { %418 = vmatpush.bf16.xpose.msrb.mxu2 %v396_v61  ;;  %36 = vst [vmem:[#allocation3] sm:$0x1f] %v1814_v1 }
 0x15b   :  { %1463 = vmatmul.msk.f32.gmra.mxu1 %vm107_vm1, %v1885_v4  ;;  %v357_v4 = vmul.f32 1.442695, %v2415_v38  ;;  %v1626_v42 = vpop.eup %1625  ;;  %v353_v38 = vmul.f32 1.442695, %v273_v0 }
 0x15c   :  { %v1628_v45 = vpop.eup %1627  ;;  %v2487_v31 = vpop.f32.mrf.mxu0 }
 0x15d   :  { %1629 = vpow2.f32 %v357_v4  ;;  %v395_v9 = vpack.c.bf16 %v1628_v45, %v1626_v42 }
 0x15e   :  { %1631 = vpow2.f32 %v359_v52  ;;  %v2816_v52 = vld [vmem:[#allocation24_spill] sm:$0xff] }
 0x15f   :  { %v626_v2 = vpop.f32.mrf.mxu3  ;;  %1521 = vmatmul.msk.f32.gmra.mxu0 %vm430_vm3, %v2816_v52 }
 0x160   :  { %v696_v17 = vmul.f32 1.442695, %v626_v2  ;;  %v694_v2 = vmul.f32 1.442695, %v2453_v27  ;;  %v690_v27 = vmul.f32 1.442695, %v2437_v63 }
 0x161   :  { %419 = vmatpush.bf16.xpose.msrb.mxu2 %v395_v9 }
 0x163   :  { %1464 = vmatmul.msk.f32.gmra.mxu1 %vm107_vm1, %v1899_v6  ;;  %v355_v6 = vmul.f32 1.442695, %v2406_v48  ;;  %v1630_v55 = vpop.eup %1629 }
 0x164   :  { %v1632_v49 = vpop.eup %1631  ;;  %v2494_v0 = vpop.f32.mrf.mxu0 }
 0x165   :  { %1633 = vpow2.f32 %v355_v6  ;;  %v394_v19 = vpack.c.bf16 %v1632_v49, %v1630_v55  ;;  %v684_v49 = vmul.f32 1.442695, %v2404_v21  ;;  %v682_v21 = vmul.f32 1.442695, %v2396_v26 }
 0x166   :  { %1635 = vpow2.f32 %v353_v38  ;;  %v2818_v38 = vld [vmem:[#allocation26_spill] sm:$0xff] }
 0x167   :  { %v629_v29 = vpop.f32.mrf.mxu3  ;;  %1522 = vmatmul.msk.f32.gmra.mxu0 %vm430_vm3, %v2818_v38 }
 0x168   :  { %v698_v37 = vmul.f32 1.442695, %v629_v29  ;;  %v2817_v29 = vld [vmem:[#allocation8_spill] sm:$0xff] }
 0x169   :  { %420 = vmatpush.bf16.xpose.msrb.mxu2 %v394_v19  ;;  %v2819_v19 = vld [vmem:[#allocation9_spill] sm:$0xff] }
 0x16b   :  { %1465 = vmatmul.msk.f32.gmra.mxu1 %vm107_vm1, %v1913_v8  ;;  %v1634_v8 = vpop.eup %1633 }
 0x16c   :  { %v1636_v48 = vpop.eup %1635  ;;  %v2500_v50 = vpop.f32.mrf.mxu0 }
 0x16d   :  { %v393_v53 = vpack.c.bf16 %v1634_v8, %v1636_v48  ;;  %v2820_v48 = vld [vmem:[#allocation27_spill] sm:$0xff] }
 0x16f   :  { %v632_v15 = vpop.f32.mrf.mxu3  ;;  %1523 = vmatmul.msk.f32.gmra.mxu0 %vm430_vm3, %v2820_v48 }
 0x171   :  { %421 = vmatpush.bf16.xpose.msrb.mxu2 %v393_v53  ;;  %v680_v53 = vmul.f32 1.442695, %v2388_v40  ;;  %v678_v40 = vmul.f32 1.442695, %v2378_v13 }
 0x173   :  { %1466 = vmatmul.msk.f32.gmra.mxu1 %vm107_vm1, %v1927_v10  ;;  %v2809_v10 = vld [vmem:[#allocation4_spill] sm:$0xff] }
 0x174   :  { %v2507_v41 = vpop.f32.mrf.mxu0 }
 0x175   :  { %v1116_v38 = vmul.f32 1.442695, %v2507_v41  ;;  %v2830_v41 = vld [vmem:[#allocation18_spill] sm:$0xff] }
 0x177   :  { %v635_v22 = vpop.f32.mrf.mxu3 }
 0x178   :  { %422 = vmatmul.bf16.vlgmr.msrb.gmra.mxu2 %v2428_v36  ;;  %v702_v43 = vmul.f32 1.442695, %v635_v22 }
 0x17b   :  { %1467 = vmatmul.msk.f32.gmra.mxu1 %vm107_vm1, %v1941_v12  ;;  %v700_v12 = vmul.f32 1.442695, %v632_v15 }
 0x17c   :  { %v2515_v45 = vpop.f32.mrf.mxu0 }
 0x17d   :  { %v1118_v52 = vmul.f32 1.442695, %v2515_v45 }
 0x17f   :  { %v638_v18 = vpop.f32.mrf.mxu3 }
 0x180   :  { %v704_v57 = vmul.f32 1.442695, %v638_v18  ;;  %v2821_v18 = vld [vmem:[#allocation10_spill] sm:$0xff] }
 0x182   :  { %1637 = vpow2.f32 %v704_v57  ;;  %v2822_v57 = vld [vmem:[#allocation28_spill] sm:$0xff] }
 0x183   :  { %1468 = vmatmul.msk.f32.gmra.mxu1 %vm107_vm1, %v2809_v10  ;;  %1524 = vmatmul.msk.f32.gmra.mxu0 %vm430_vm3, %v2822_v57  ;;  %v1104_v57 = vmul.f32 1.442695, %v2468_v46  ;;  %v2833_v46 = vld [vmem:[#allocation25_spill] sm:$0xff] }
 0x184   :  { %v1035_v15 = vpop.f32.mrf.mxu0 }
 0x187   :  { %v641_v58 = vpop.f32.mrf.mxu3 }
 0x188   :  { %v706_v25 = vmul.f32 1.442695, %v641_v58  ;;  %v1638_v30 = vpop.eup %1637  ;;  %v676_v58 = vmul.f32 1.442695, %v2367_v7 }
 0x18a   :  { %1639 = vpow2.f32 %v706_v25 }
 0x18b   :  { %1469 = vmatmul.msk.f32.gmra.mxu1 %vm107_vm1, %v2811_v33  ;;  %1641 = vpow2.f32 %v700_v12  ;;  %v2823_v12 = vld [vmem:[#allocation11_spill] sm:$0xff]  ;;  %v2824_v33 = vld [vmem:[#allocation29_spill] sm:$0xff] }
 0x18c   :  { %1643 = vpow2.f32 %v702_v43  ;;  %v1038_v56 = vpop.f32.mrf.mxu0  ;;  %1525 = vmatmul.msk.f32.gmra.mxu0 %vm430_vm3, %v2824_v33 }
 0x18d   :  { %1645 = vpow2.f32 %v696_v17 }
 0x18e   :  { %1647 = vpow2.f32 %v698_v37 }
 0x18f   :  { %1649 = vpow2.f32 %v692_v44 }
 0x190   :  { %v1640_v11 = vpop.eup %1639  ;;  %1651 = vpow2.f32 %v694_v2 }
 0x191   :  { %v723_v34 = vpack.c.bf16 %v1640_v11, %v1638_v30  ;;  %v1642_v24 = vpop.eup %1641  ;;  %1653 = vpow2.f32 %v688_v28 }
 0x192   :  { %v1644_v20 = vpop.eup %1643  ;;  %1655 = vpow2.f32 %v690_v27 }
 0x193   :  { %1470 = vmatmul.msk.f32.gmra.mxu1 %vm107_vm1, %v2813_v60  ;;  %737 = vmatpush.bf16.xpose.msra.mxu2 %v723_v34  ;;  %v722_v59 = vpack.c.bf16 %v1644_v20, %v1642_v24  ;;  %v1646_v61 = vpop.eup %1645  ;;  %1657 = vpow2.f32 %v684_v49  ;;  %v2825_v34 = vld [vmem:[#allocation12_spill] sm:$0xff]  ;;  %v2826_v20 = vld [vmem:[#allocation13_spill] sm:$0xff] }
 0x194   :  { %v1648_v4 = vpop.eup %1647  ;;  %1659 = vpow2.f32 %v686_v51  ;;  %v1041_v25 = vpop.f32.mrf.mxu0 }
 0x195   :  { %v721_v42 = vpack.c.bf16 %v1648_v4, %v1646_v61  ;;  %v1650_v9 = vpop.eup %1649  ;;  %1661 = vpow2.f32 %v680_v53  ;;  %v1124_v1 = vmul.f32 1.442695, %v1041_v25  ;;  %v2827_v61 = vld [vmem:[#allocation22_spill] sm:$0xff]  ;;  %v1106_v53 = vmul.f32 1.442695, %v2475_v23 }
 0x196   :  { %v1652_v6 = vpop.eup %1651  ;;  %1663 = vpow2.f32 %v682_v21 }
 0x197   :  { %v720_v55 = vpack.c.bf16 %v1652_v6, %v1650_v9  ;;  %v1654_v63 = vpop.eup %1653  ;;  %1665 = vpow2.f32 %v676_v58  ;;  %v2828_v9 = vld [vmem:[#allocation14_spill] sm:$0xff] }
 0x198   :  { %v1656_v8 = vpop.eup %1655  ;;  %1667 = vpow2.f32 %v678_v40  ;;  %v1098_v40 = vmul.f32 1.442695, %v2445_v39  ;;  %v1805_v39 = vld [vmem:[%s2746_s0 + $0xb8] sm:$0xff] }
 0x199   :  { %v719_v22 = vpack.c.bf16 %v1656_v8, %v1654_v63  ;;  %v1658_v14 = vpop.eup %1657  ;;  %v1112_v63 = vmul.f32 1.442695, %v2494_v0  ;;  %v2831_v0 = vld [vmem:[#allocation20_spill] sm:$0xff] }
 0x19a   :  { %v1660_v10 = vpop.eup %1659 }
 0x19b   :  { %1471 = vmatmul.msk.f32.gmra.mxu1 %vm107_vm1, %v2815_v32  ;;  %738 = vmatpush.bf16.xpose.msra.mxu2 %v722_v59  ;;  %v718_v47 = vpack.c.bf16 %v1660_v10, %v1658_v14  ;;  %v1662_v26 = vpop.eup %1661  ;;  %v1122_v59 = vmul.f32 1.442695, %v1038_v56  ;;  %v1108_v56 = vmul.f32 1.442695, %v2481_v16  ;;  %v1102_v10 = vmul.f32 1.442695, %v2461_v62 }
 0x19c   :  { %v1664_v43 = vpop.eup %1663  ;;  %v1044_v11 = vpop.f32.mrf.mxu0  ;;  %v2832_v16 = vld [vmem:[#allocation23_spill] sm:$0xff] }
 0x19d   :  { %v717_v30 = vpack.c.bf16 %v1664_v43, %v1662_v26  ;;  %v1666_v7 = vpop.eup %1665  ;;  %v1126_v17 = vmul.f32 1.442695, %v1044_v11 }
 0x19e   :  { %v1668_v13 = vpop.eup %1667 }
 0x19f   :  { %v716_v37 = vpack.c.bf16 %v1668_v13, %v1666_v7  ;;  %1669 = vpow2.f32 %v1126_v17  ;;  %v1806_v13 = vld [vmem:[%s2746_s0 + $0xc0] sm:$0xff] }
 0x1a3   :  { %1472 = vmatmul.msk.f32.gmra.mxu1 %vm107_vm1, %v2817_v29  ;;  %739 = vmatpush.bf16.xpose.msra.mxu2 %v721_v42  ;;  %v1120_v42 = vmul.f32 1.442695, %v1035_v15  ;;  %v2829_v15 = vld [vmem:[#allocation16_spill] sm:$0xff] }
 0x1a4   :  { %v1047_v60 = vpop.f32.mrf.mxu0 }
 0x1a5   :  { %v1128_v54 = vmul.f32 1.442695, %v1047_v60  ;;  %v1670_v2 = vpop.eup %1669  ;;  %v1808_v60 = vld [vmem:[%s2746_s0 + $0xd0] sm:$0xff] }
 0x1a7   :  { %1671 = vpow2.f32 %v1128_v54  ;;  %v1809_v54 = vld [vmem:[%s2746_s0 + $0xd8] sm:$0xff] }
 0x1a8   :  { %1673 = vpow2.f32 %v1122_v59 }
 0x1a9   :  { %1675 = vpow2.f32 %v1124_v1  ;;  %v1810_v1 = vld [vmem:[%s2746_s0 + $0xe0] sm:$0xff] }
 0x1aa   :  { %1677 = vpow2.f32 %v1118_v52 }
 0x1ab   :  { %1473 = vmatmul.msk.f32.gmra.mxu1 %vm107_vm1, %v2819_v19  ;;  %740 = vmatpush.bf16.xpose.msra.mxu2 %v720_v55  ;;  %1679 = vpow2.f32 %v1120_v42  ;;  %v1110_v19 = vmul.f32 1.442695, %v2487_v31 }
 0x1ad   :  { %v1672_v32 = vpop.eup %1671 }
 0x1ae   :  { %v1169_v4 = vpack.c.bf16 %v1672_v32, %v1670_v2  ;;  %v1674_v28 = vpop.eup %1673  ;;  %v1811_v32 = vld [vmem:[%s2746_s0 + $0xe8] sm:$0xff] }
 0x1af   :  { %v1676_v27 = vpop.eup %1675 }
 0x1b0   :  { %1178 = vmatpush.bf16.xpose.msrb.mxu3 %v1169_v4  ;;  %v1168_v6 = vpack.c.bf16 %v1676_v27, %v1674_v28  ;;  %v1678_v55 = vpop.eup %1677  ;;  %v1812_v4 = vld [vmem:[%s2746_s0 + $0xf0] sm:$0xff]  ;;  %v1813_v27 = vld [vmem:[%s2746_s0 + $0xf8] sm:$0xff] }
 0x1b1   :  { %v1680_v49 = vpop.eup %1679 }
 0x1b2   :  { %v1167_v51 = vpack.c.bf16 %v1680_v49, %v1678_v55 }
 0x1b3   :  { %1474 = vmatmul.msk.f32.gmra.mxu1 %vm107_vm1, %v2821_v18  ;;  %741 = vmatpush.bf16.xpose.msra.mxu2 %v719_v22 }
 0x1b8   :  { %1179 = vmatpush.bf16.xpose.msrb.mxu3 %v1168_v6 }
 0x1bb   :  { %1475 = vmatmul.msk.f32.gmra.mxu1 %vm107_vm1, %v2823_v12  ;;  %742 = vmatpush.bf16.xpose.msra.mxu2 %v718_v47  ;;  %v1100_v12 = vmul.f32 1.442695, %v2455_v35 }
 0x1c0   :  { %v2540_v5 = vpop.f32.mrf.mxu1  ;;  %1180 = vmatpush.bf16.xpose.msrb.mxu3 %v1167_v51 }
 0x1c3   :  { %1476 = vmatmul.msk.f32.gmra.mxu1 %vm107_vm1, %v2825_v34  ;;  %743 = vmatpush.bf16.xpose.msra.mxu2 %v717_v30 }
 0x1c8   :  { %v412_v24 = vpop.f32.mrf.mxu1 }
 0x1c9   :  { %v1807_v24 = vld [vmem:[%s2746_s0 + $0xc8] sm:$0xff] }
 0x1cb   :  { %1477 = vmatmul.msk.f32.gmra.mxu1 %vm107_vm1, %v2826_v20  ;;  %744 = vmatpush.bf16.xpose.msra.mxu2 %v716_v37 }
 0x1d0   :  { %v2546_v44 = vpop.f32.mrf.mxu1 }
 0x1d2   :  { %745 = vmatmul.bf16.vlgmr.msra.gmra.mxu2 %v2428_v36  ;;  %v1114_v36 = vmul.f32 1.442695, %v2500_v50 }
 0x1d3   :  { %1478 = vmatmul.msk.f32.gmra.mxu1 %vm107_vm1, %v2827_v61 }
 0x1d4   :  { %1681 = vpow2.f32 %v1114_v36 }
 0x1d5   :  { %1683 = vpow2.f32 %v1116_v38 }
 0x1d6   :  { %1685 = vpow2.f32 %v1110_v19 }
 0x1d7   :  { %1687 = vpow2.f32 %v1112_v63 }
 0x1d8   :  { %v2552_v29 = vpop.f32.mrf.mxu1  ;;  %1689 = vpow2.f32 %v1106_v53 }
 0x1d9   :  { %1691 = vpow2.f32 %v1108_v56 }
 0x1da   :  { %v1682_v8 = vpop.eup %1681  ;;  %1693 = vpow2.f32 %v1102_v10 }
 0x1db   :  { %1479 = vmatmul.msk.f32.gmra.mxu1 %vm107_vm1, %v2828_v9  ;;  %v1684_v50 = vpop.eup %1683  ;;  %1695 = vpow2.f32 %v1104_v57 }
 0x1dc   :  { %v1166_v22 = vpack.c.bf16 %v1684_v50, %v1682_v8  ;;  %v1686_v21 = vpop.eup %1685  ;;  %1697 = vpow2.f32 %v1098_v40 }
 0x1dd   :  { %v1688_v31 = vpop.eup %1687  ;;  %1699 = vpow2.f32 %v1100_v12 }
 0x1de   :  { %1181 = vmatpush.bf16.xpose.msrb.mxu3 %v1166_v22  ;;  %v1165_v14 = vpack.c.bf16 %v1688_v31, %v1686_v21  ;;  %v1690_v47 = vpop.eup %1689 }
 0x1df   :  { %v1692_v23 = vpop.eup %1691 }
 0x1e0   :  { %v2558_v45 = vpop.f32.mrf.mxu1  ;;  %v1164_v25 = vpack.c.bf16 %v1692_v23, %v1690_v47  ;;  %v1694_v26 = vpop.eup %1693 }
 0x1e1   :  { %v1696_v62 = vpop.eup %1695 }
 0x1e2   :  { %v1163_v33 = vpack.c.bf16 %v1696_v62, %v1694_v26  ;;  %v1698_v30 = vpop.eup %1697 }
 0x1e3   :  { %1480 = vmatmul.msk.f32.gmra.mxu1 %vm107_vm1, %v2829_v15  ;;  %v1700_v11 = vpop.eup %1699  ;;  %v2834_v15 = vld [vmem:[#allocation30_spill] sm:$0xff] }
 0x1e4   :  { %v1162_v35 = vpack.c.bf16 %v1700_v11, %v1698_v30 }
 0x1e6   :  { %1182 = vmatpush.bf16.xpose.msrb.mxu3 %v1165_v14 }
 0x1e8   :  { %v2564_v48 = vpop.f32.mrf.mxu1 }
 0x1eb   :  { %1481 = vmatmul.msk.f32.gmra.mxu1 %vm107_vm1, %v2830_v41 }
 0x1ee   :  { %1183 = vmatpush.bf16.xpose.msrb.mxu3 %v1164_v25 }
 0x1f0   :  { %v2570_v18 = vpop.f32.mrf.mxu1 }
 0x1f3   :  { %1482 = vmatmul.msk.f32.gmra.mxu1 %vm107_vm1, %v2831_v0 }
 0x1f6   :  { %1184 = vmatpush.bf16.xpose.msrb.mxu3 %v1163_v33 }
 0x1f8   :  { %v2576_v58 = vpop.f32.mrf.mxu1 }
 0x1f9   :  { %v882_v33 = vmul.f32 1.442695, %v2576_v58  ;;  %v878_v58 = vmul.f32 1.442695, %v2564_v48 }
 0x1fb   :  { %1483 = vmatmul.msk.f32.gmra.mxu1 %vm107_vm1, %v2832_v16 }
 0x1fe   :  { %1185 = vmatpush.bf16.xpose.msrb.mxu3 %v1162_v35 }
 0x200   :  { %v2582_v43 = vpop.f32.mrf.mxu1 }
 0x201   :  { %v884_v16 = vmul.f32 1.442695, %v2582_v43  ;;  %v880_v43 = vmul.f32 1.442695, %v2570_v18  ;;  %v876_v18 = vmul.f32 1.442695, %v2558_v45 }
 0x203   :  { %1484 = vmatmul.msk.f32.gmra.mxu1 %vm107_vm1, %v2833_v46 }
 0x208   :  { %v2586_v34 = vpop.f32.mrf.mxu1 }
 0x20b   :  { %1485 = vmatmul.msk.f32.gmra.mxu1 %vm107_vm1, %v1805_v39 }
 0x210   :  { %v800_v7 = vpop.f32.mrf.mxu1 }
 0x211   :  { %v888_v0 = vmul.f32 1.442695, %v800_v7 }
 0x213   :  { %1486 = vmatmul.msk.f32.gmra.mxu1 %vm107_vm1, %v1806_v13  ;;  %v2645_v13 = vld [vmem:[%s2749_s4 + $0x4] sm:$0x7] }
 0x214   :  { %1186 = vmatmul.bf16.vlgmr.msrb.gmra.mxu3 %v2645_v13 }
 0x218   :  { %v803_v17 = vpop.f32.mrf.mxu1 }
 0x219   :  { %v890_v56 = vmul.f32 1.442695, %v803_v17 }
 0x21b   :  { %1487 = vmatmul.msk.f32.gmra.mxu1 %vm107_vm1, %v1807_v24 }
 0x220   :  { %v806_v37 = vpop.f32.mrf.mxu1 }
 0x221   :  { %v892_v51 = vmul.f32 1.442695, %v806_v37 }
 0x223   :  { %1488 = vmatmul.msk.f32.gmra.mxu1 %vm107_vm1, %v1808_v60 }
 0x228   :  { %v809_v20 = vpop.f32.mrf.mxu1 }
 0x229   :  { %v894_v19 = vmul.f32 1.442695, %v809_v20 }
 0x22b   :  { %1489 = vmatmul.msk.f32.gmra.mxu1 %vm107_vm1, %v1809_v54 }
 0x230   :  { %v812_v59 = vpop.f32.mrf.mxu1 }
 0x231   :  { %v896_v6 = vmul.f32 1.442695, %v812_v59  ;;  %v1050_v59 = vpop.f32.mrf.mxu0 }
 0x233   :  { %1490 = vmatmul.msk.f32.gmra.mxu1 %vm107_vm1, %v1810_v1 }
 0x238   :  { %v815_v2 = vpop.f32.mrf.mxu1 }
 0x239   :  { %v898_v9 = vmul.f32 1.442695, %v815_v2  ;;  %v874_v2 = vmul.f32 1.442695, %v2552_v29 }
 0x23b   :  { %1491 = vmatmul.msk.f32.gmra.mxu1 %vm107_vm1, %v1811_v32 }
 0x240   :  { %v818_v61 = vpop.f32.mrf.mxu1 }
 0x241   :  { %v900_v52 = vmul.f32 1.442695, %v818_v61  ;;  %v1130_v61 = vmul.f32 1.442695, %v1050_v59 }
 0x243   :  { %1492 = vmatmul.msk.f32.gmra.mxu1 %vm107_vm1, %v1812_v4  ;;  %1701 = vpow2.f32 %v900_v52  ;;  %v872_v4 = vmul.f32 1.442695, %v2546_v44 }
 0x248   :  { %v821_v42 = vpop.f32.mrf.mxu1 }
 0x249   :  { %v902_v28 = vmul.f32 1.442695, %v821_v42  ;;  %v1702_v36 = vpop.eup %1701 }
 0x24b   :  { %1703 = vpow2.f32 %v902_v28  ;;  %1493 = vmatmul.msk.f32.gmra.mxu1 %vm107_vm1, %v1813_v27  ;;  %v1053_v28 = vpop.f32.mrf.mxu0 }
 0x24c   :  { %1705 = vpow2.f32 %v898_v9  ;;  %v1132_v9 = vmul.f32 1.442695, %v1053_v28 }
 0x24d   :  { %1707 = vpow2.f32 %v896_v6 }
 0x24e   :  { %1709 = vpow2.f32 %v892_v51 }
 0x24f   :  { %1711 = vpow2.f32 %v894_v19 }
 0x250   :  { %v824_v38 = vpop.f32.mrf.mxu1 }
 0x251   :  { %v1704_v55 = vpop.eup %1703  ;;  %v904_v63 = vmul.f32 1.442695, %v824_v38 }
 0x252   :  { %v943_v49 = vpack.c.bf16 %v1704_v55, %v1702_v36  ;;  %v1706_v8 = vpop.eup %1705 }
 0x253   :  { %1526 = vmatmul.msk.f32.vlgmr.msrb.gmra.mxu1 %vm430_vm3, %v2834_v15  ;;  %v1708_v41 = vpop.eup %1707  ;;  %1713 = vpow2.f32 %v904_v63  ;;  %v1056_v15 = vpop.f32.mrf.mxu0 }
 0x254   :  { %952 = vmatpush.bf16.xpose.msrb.mxu2 %v943_v49  ;;  %v942_v53 = vpack.c.bf16 %v1706_v8, %v1708_v41  ;;  %v1710_v21 = vpop.eup %1709  ;;  %v1134_v8 = vmul.f32 1.442695, %v1056_v15 }
 0x255   :  { %v1712_v31 = vpop.eup %1711 }
 0x256   :  { %v941_v47 = vpack.c.bf16 %v1712_v31, %v1710_v21 }
 0x258   :  { %v827_v50 = vpop.f32.mrf.mxu1 }
 0x259   :  { %v906_v22 = vmul.f32 1.442695, %v827_v50  ;;  %v2628_v14 = vpop.eup %1713 }
 0x25b   :  { %1715 = vpow2.f32 %v906_v22  ;;  %1527 = vmatmul.msk.f32.gmra.mxu1 %vm430_vm3, %v2353_v3  ;;  %v886_v3 = vmul.f32 1.442695, %v2586_v34 }
 0x25c   :  { %953 = vmatpush.bf16.xpose.msrb.mxu2 %v942_v53  ;;  %1717 = vpow2.f32 %v890_v56  ;;  %v1059_v53 = vpop.f32.mrf.mxu0 }
 0x25d   :  { %1719 = vpow2.f32 %v888_v0  ;;  %v1136_v56 = vmul.f32 1.442695, %v1059_v53 }
 0x25e   :  { %1721 = vpow2.f32 %v884_v16 }
 0x25f   :  { %1723 = vpow2.f32 %v886_v3 }
 0x260   :  { %v830_v10 = vpop.f32.mrf.mxu1 }
 0x261   :  { %v2630_v57 = vpop.eup %1715  ;;  %v908_v25 = vmul.f32 1.442695, %v830_v10 }
 0x262   :  { %v944_v23 = vpack.c.bf16 %v2630_v57, %v2628_v14  ;;  %v1718_v40 = vpop.eup %1717 }
 0x263   :  { %v1720_v26 = vpop.eup %1719  ;;  %1725 = vpow2.f32 %v908_v25 }
 0x264   :  { %954 = vmatpush.bf16.xpose.msrb.mxu2 %v941_v47  ;;  %v940_v46 = vpack.c.bf16 %v1718_v40, %v1720_v26  ;;  %v1722_v30 = vpop.eup %1721  ;;  %v1062_v16 = vpop.f32.mrf.mxu0 }
 0x265   :  { %v1724_v11 = vpop.eup %1723  ;;  %v1138_v40 = vmul.f32 1.442695, %v1062_v16 }
 0x266   :  { %v939_v7 = vpack.c.bf16 %v1724_v11, %v1722_v30 }
 0x268   :  { %v833_v12 = vpop.f32.mrf.mxu1 }
 0x269   :  { %v910_v62 = vmul.f32 1.442695, %v833_v12  ;;  %v2638_v39 = vpop.eup %1725 }
 0x26b   :  { %1727 = vpow2.f32 %v910_v62 }
 0x26c   :  { %955 = vmatpush.bf16.xpose.msrb.mxu2 %v940_v46  ;;  %1729 = vpow2.f32 %v882_v33  ;;  %v1065_v46 = vpop.f32.mrf.mxu0 }
 0x26d   :  { %1731 = vpow2.f32 %v880_v43  ;;  %v1140_v33 = vmul.f32 1.442695, %v1065_v46 }
 0x26e   :  { %1733 = vpow2.f32 %v876_v18 }
 0x26f   :  { %1735 = vpow2.f32 %v878_v58 }
 0x270   :  { %v836_v34 = vpop.f32.mrf.mxu1 }
 0x271   :  { %v2640_v35 = vpop.eup %1727  ;;  %v912_v24 = vmul.f32 1.442695, %v836_v34 }
 0x272   :  { %v945_v17 = vpack.c.bf16 %v2640_v35, %v2638_v39  ;;  %v1730_v37 = vpop.eup %1729 }
 0x273   :  { %v1732_v20 = vpop.eup %1731  ;;  %1737 = vpow2.f32 %v912_v24 }
 0x274   :  { %956 = vmatpush.bf16.xpose.msrb.mxu2 %v939_v7  ;;  %v938_v1 = vpack.c.bf16 %v1730_v37, %v1732_v20  ;;  %v1734_v32 = vpop.eup %1733  ;;  %v1068_v34 = vpop.f32.mrf.mxu0 }
 0x275   :  { %v1736_v45 = vpop.eup %1735  ;;  %v1142_v58 = vmul.f32 1.442695, %v1068_v34 }
 0x276   :  { %v937_v27 = vpack.c.bf16 %v1736_v45, %v1734_v32 }
 0x278   :  { %v839_v60 = vpop.f32.mrf.mxu1 }
 0x279   :  { %v914_v54 = vmul.f32 1.442695, %v839_v60  ;;  %v2654_v48 = vpop.eup %1737 }
 0x27b   :  { %1739 = vpow2.f32 %v914_v54 }
 0x27c   :  { %957 = vmatpush.bf16.xpose.msrb.mxu2 %v938_v1  ;;  %1741 = vpow2.f32 %v874_v2  ;;  %v1071_v37 = vpop.f32.mrf.mxu0 }
 0x27d   :  { %1743 = vpow2.f32 %v1130_v61  ;;  %v1144_v60 = vmul.f32 1.442695, %v1071_v37 }
 0x27e   :  { %1745 = vpow2.f32 %v872_v4 }
 0x27f   :  { %1747 = vpow2.f32 %v1132_v9 }
 0x280   :  { %v842_v52 = vpop.f32.mrf.mxu1 }
 0x281   :  { %v2656_v42 = vpop.eup %1739  ;;  %v916_v29 = vmul.f32 1.442695, %v842_v52 }
 0x282   :  { %v946_v6 = vpack.c.bf16 %v2656_v42, %v2654_v48  ;;  %v1742_v36 = vpop.eup %1741 }
 0x283   :  { %v2660_v38 = vpop.eup %1743  ;;  %1749 = vpow2.f32 %v916_v29 }
 0x284   :  { %958 = vmatpush.bf16.xpose.msrb.mxu2 %v937_v27  ;;  %v1746_v55 = vpop.eup %1745  ;;  %v1074_v9 = vpop.f32.mrf.mxu0 }
 0x285   :  { %v2662_v51 = vpop.eup %1747  ;;  %v936_v19 = vpack.c.bf16 %v1742_v36, %v1746_v55  ;;  %v2691_v36 = vpop.f32.mrf.mxu2 }
 0x286   :  { %v1170_v63 = vpack.c.bf16 %v2662_v51, %v2660_v38  ;;  %v1282_v38 = vld [vmem:[%s2750_s6] sm:$0xf] }
 0x288   :  { %v845_v44 = vpop.f32.mrf.mxu1 }
 0x289   :  { %v918_v49 = vmul.f32 1.442695, %v845_v44  ;;  %v2666_v50 = vpop.eup %1749 }
 0x28b   :  { %1751 = vpow2.f32 %v918_v49 }
 0x28c   :  { %959 = vmatpush.bf16.xpose.msrb.mxu2 %v936_v19  ;;  %1753 = vpow2.f32 %v1134_v8  ;;  %v1077_v8 = vpop.f32.mrf.mxu0 }
 0x28d   :  { %1755 = vpow2.f32 %v1136_v56  ;;  %v1148_v37 = vmul.f32 1.442695, %v1077_v8 }
 0x290   :  { %v848_v41 = vpop.f32.mrf.mxu1 }
 0x291   :  { %v2668_v22 = vpop.eup %1751  ;;  %v920_v31 = vmul.f32 1.442695, %v848_v41  ;;  %v425_v41 = vpop.f32.mrf.mxu2 }
 0x292   :  { %v947_v21 = vpack.c.bf16 %v2668_v22, %v2666_v50  ;;  %v2673_v0 = vpop.eup %1753 }
 0x293   :  { %960 = vmatmul.bf16.vlgmr.msrb.gmra.mxu2 %v2645_v13  ;;  %v2675_v3 = vpop.eup %1755  ;;  %1757 = vpow2.f32 %v920_v31 }
 0x294   :  { %v1171_v25 = vpack.c.bf16 %v2675_v3, %v2673_v0 }
 0x298   :  { %v851_v10 = vpop.f32.mrf.mxu1 }
 0x299   :  { %v922_v47 = vmul.f32 1.442695, %v851_v10  ;;  %v1758_v12 = vpop.eup %1757  ;;  %v2693_v10 = vpop.f32.mrf.mxu2 }
 0x29b   :  { %1759 = vpow2.f32 %v922_v47  ;;  %v1080_v47 = vpop.f32.mrf.mxu0 }
 0x29c   :  { %1761 = vpow2.f32 %v1138_v40  ;;  %v1150_v48 = vmul.f32 1.442695, %v1080_v47 }
 0x29d   :  { %1763 = vpow2.f32 %v1140_v33 }
 0x29e   :  { %1765 = vpow2.f32 %v1142_v58 }
 0x29f   :  { %1767 = vpow2.f32 %v1144_v60 }
 0x2a0   :  { %v854_v26 = vpop.f32.mrf.mxu1 }
 0x2a1   :  { %v1760_v62 = vpop.eup %1759  ;;  %v924_v49 = vmul.f32 1.442695, %v854_v26  ;;  %v748_v16 = vpop.f32.mrf.mxu2 }
 0x2a2   :  { %v948_v30 = vpack.c.bf16 %v1760_v62, %v1758_v12  ;;  %v2679_v11 = vpop.eup %1761 }
 0x2a3   :  { %v2681_v7 = vpop.eup %1763  ;;  %v1083_v40 = vpop.f32.mrf.mxu0 }
 0x2a4   :  { %v1172_v18 = vpack.c.bf16 %v2681_v7, %v2679_v11  ;;  %v2685_v20 = vpop.eup %1765  ;;  %v1152_v42 = vmul.f32 1.442695, %v1083_v40 }
 0x2a5   :  { %v2687_v59 = vpop.eup %1767 }
 0x2a6   :  { %v1173_v1 = vpack.c.bf16 %v2687_v59, %v2685_v20  ;;  %v103_v20 = vld [vmem:[#allocation3 + $0x8] sm:$0x1f] }
 0x2a8   :  { %v857_v43 = vpop.f32.mrf.mxu1 }
 0x2a9   :  { %v926_v44 = vmul.f32 1.442695, %v857_v43 }
 0x2ab   :  { %v1086_v26 = vpop.f32.mrf.mxu0 }
 0x2b0   :  { %v860_v24 = vpop.f32.mrf.mxu1 }
 0x2b1   :  { %v928_v52 = vmul.f32 1.442695, %v860_v24  ;;  %v101_v24 = vld [vmem:[#allocation2] sm:$0x1f] }
 0x2b2   :  { %v427_v35 = vadd.f32 %v2540_v5, %v101_v24 }
 0x2b3   :  { %v1089_v43 = vpop.f32.mrf.mxu0 }
 0x2b4   :  { %v1156_v34 = vmul.f32 1.442695, %v1089_v43 }
 0x2b8   :  { %v863_v54 = vpop.f32.mrf.mxu1 }
 0x2b9   :  { %v930_v4 = vmul.f32 1.442695, %v863_v54 }
 0x2c0   :  { %v866_v2 = vpop.f32.mrf.mxu1 }
 0x2c1   :  { %v932_v32 = vmul.f32 1.442695, %v866_v2 }
 0x2c3   :  { %1769 = vpow2.f32 %v932_v32 }
 0x2c8   :  { %v869_v61 = vpop.f32.mrf.mxu1 }
 0x2c9   :  { %v934_v45 = vmul.f32 1.442695, %v869_v61  ;;  %v1770_v28 = vpop.eup %1769 }
 0x2cb   :  { %1771 = vpow2.f32 %v934_v45 }
 0x2cc   :  { %1773 = vpow2.f32 %v930_v4 }
 0x2cd   :  { %1775 = vpow2.f32 %v928_v52 }
 0x2ce   :  { %1777 = vpow2.f32 %v926_v44 }
 0x2cf   :  { %1779 = vpow2.f32 %v924_v49 }
 0x2d0   :  { %v1092_v12 = vpop.f32.mrf.mxu1 }
 0x2d1   :  { %v1772_v27 = vpop.eup %1771  ;;  %v1158_v46 = vmul.f32 1.442695, %v1092_v12 }
 0x2d2   :  { %v951_v29 = vpack.c.bf16 %v1772_v27, %v1770_v28  ;;  %v1774_v55 = vpop.eup %1773 }
 0x2d3   :  { %v1776_v15 = vpop.eup %1775  ;;  %1781 = vpow2.f32 %v1158_v46 }
 0x2d4   :  { %965 = vmatpush.bf16.xpose.msra.mxu2 %v951_v29  ;;  %v950_v19 = vpack.c.bf16 %v1774_v55, %v1776_v15  ;;  %v1778_v53 = vpop.eup %1777 }
 0x2d5   :  { %v1780_v56 = vpop.eup %1779 }
 0x2d6   :  { %v949_v31 = vpack.c.bf16 %v1778_v53, %v1780_v56 }
 0x2d8   :  { %v1095_v62 = vpop.f32.mrf.mxu1 }
 0x2d9   :  { %v1160_v33 = vmul.f32 1.442695, %v1095_v62  ;;  %v1782_v58 = vpop.eup %1781 }
 0x2db   :  { %1783 = vpow2.f32 %v1160_v33 }
 0x2dc   :  { %966 = vmatpush.bf16.xpose.msra.mxu2 %v950_v19 }
 0x2e1   :  { %v1784_v50 = vpop.eup %1783 }
 0x2e2   :  { %v1177_v22 = vpack.c.bf16 %v1784_v50, %v1782_v58 }
 0x2e4   :  { %967 = vmatpush.bf16.xpose.msra.mxu2 %v949_v31 }
 0x2ec   :  { %968 = vmatpush.bf16.xpose.msra.mxu2 %v948_v30  ;;  %v1154_v30 = vmul.f32 1.442695, %v1086_v26 }
 0x2ee   :  { %1785 = vpow2.f32 %v1154_v30 }
 0x2ef   :  { %1787 = vpow2.f32 %v1156_v34 }
 0x2f0   :  { %1789 = vpow2.f32 %v1150_v48 }
 0x2f1   :  { %1791 = vpow2.f32 %v1152_v42 }
 0x2f4   :  { %969 = vmatpush.bf16.xpose.msra.mxu2 %v947_v21 }
 0x2fc   :  { %970 = vmatpush.bf16.xpose.msra.mxu2 %v946_v6  ;;  %v1786_v6 = vpop.eup %1785 }
 0x2fd   :  { %v1788_v21 = vpop.eup %1787 }
 0x2fe   :  { %v1176_v39 = vpack.c.bf16 %v1788_v21, %v1786_v6  ;;  %v1790_v54 = vpop.eup %1789 }
 0x2ff   :  { %v1792_v57 = vpop.eup %1791 }
 0x304   :  { %971 = vmatpush.bf16.xpose.msra.mxu2 %v945_v17  ;;  %v1146_v17 = vmul.f32 1.442695, %v1074_v9  ;;  %v733_v9 = vpop.f32.mrf.mxu3 }
 0x305   :  { %v750_v59 = vadd.f32 %v733_v9, %v103_v20 }
 0x306   :  { %1793 = vpow2.f32 %v1146_v17  ;;  %v1281_v17 = vld [vmem:[%s2751_s7] sm:$0xf] }
 0x307   :  { %1795 = vpow2.f32 %v1148_v37  ;;  %v104_v37 = vld [vmem:[#allocation3] sm:$0x1f] }
 0x30c   :  { %972 = vmatpush.bf16.xpose.msra.mxu2 %v944_v23  ;;  %v1175_v23 = vpack.c.bf16 %v1792_v57, %v1790_v54  ;;  %v1794_v32 = vpop.eup %1793  ;;  %v735_v53 = vpop.f32.mrf.mxu3 }
 0x30d   :  { %v1796_v61 = vpop.eup %1795 }
 0x30e   :  { %v1174_v52 = vpack.c.bf16 %v1796_v61, %v1794_v32 }
 0x313   :  { %973 = vmatmul.bf16.vlgmr.msra.gmra.mxu2 %v2645_v13 }
 0x314   :  { %1191 = vmatpush.bf16.xpose.msrb.mxu2 %v1177_v22 }
 0x316   :  { %v961_v60 = vpop.f32.mrf.mxu2 }
 0x317   :  { %v978_v14 = vadd.f32 %v961_v60, %v427_v35  ;;  %v751_v60 = vadd.f32 %v2693_v10, %v104_v37 }
 0x319   :  { %1206 = vst [vmem:[#allocation2] sm:$0x1f] %v978_v14 }
 0x31c   :  { %1192 = vmatpush.bf16.xpose.msrb.mxu2 %v1176_v39 }
 0x31e   :  { %v963_v2 = vpop.f32.mrf.mxu2 }
 0x320   :  { %v1213_v45 = vld [vmem:[#allocation2] sm:$0x1f] }
 0x321   :  { %v1217_v4 = vperm.slane %v1213_v45, 4 }
 0x323   :  { %1797 = vrcp.f32 %v1217_v4  ;;  %v1230_v29 = vand.u32 2147483648, %v1217_v4  ;;  %v1228_v55 = vand.u32 2147483647, %v1217_v4  ;;  %vm1224_vm5 = vweird.f32 %v1217_v4 }
 0x324   :  { %1193 = vmatpush.bf16.xpose.msrb.mxu2 %v1175_v23 }
 0x325   :  { %v1231_v15 = vor.u32 1.1754944e-38, %v1230_v29  ;;  %vm1229_vm7 = vcmp.eq.f32.partialorder %v1228_v55, 8.507059e+37 }
 0x329   :  { %v1798_v5 = vpop.eup %1797 }
 0x32a   :  { %v1220_v28 = vmul.f32 %v1798_v5, %v1217_v4  ;;  %vm1225_vm4 = vweird.f32 %v1798_v5 }
 0x32b   :  { %vm1226_vm6 = vmor %vm1224_vm5, %vm1225_vm4 }
 0x32c   :  { %1194 = vmatpush.bf16.xpose.msrb.mxu2 %v1174_v52  ;;  %v1221_v27 = vsub.f32 1.0, %v1220_v28 }
 0x32e   :  { %v1222_v44 = vmul.f32 %v1798_v5, %v1221_v27 }
 0x330   :  { %v1223_v49 = vadd.f32 %v1798_v5, %v1222_v44 }
 0x332   :  { %v1227_v19 = vsel %vm1226_vm6, %v1798_v5, %v1223_v49 }
 0x333   :  { %v1232_v8 = vsel %vm1229_vm7, %v1231_v15, %v1227_v19 }
 0x334   :  { %1195 = vmatpush.bf16.xpose.msrb.mxu2 %v1173_v1  ;;  %v1233_v41 = vmul.f32 %v1232_v8, %v1213_v45  ;;  %v1187_v1 = vpop.f32.mrf.mxu3 }
 0x335   :  { %v1204_v56 = vadd.f32 %v1187_v1, %v750_v59 }
 0x336   :  { %1528 = vmatpush.msk.msra.mxu3 %vm204_vm0, %v1233_v41  ;;  %v1381_v41 = vld [vmem:[%s2752_s5] sm:$0xff] }
 0x337   :  { %1208 = vst [vmem:[#allocation3 + $0x8] sm:$0x1f] %v1204_v56  ;;  %1529 = vmatmul.msk.f32.vlgmr.msra.gmra.mxu3 %vm107_vm1, %v1282_v38 }
 0x33c   :  { %1196 = vmatpush.bf16.xpose.msrb.mxu2 %v1172_v18  ;;  %v1189_v31 = vpop.f32.mrf.mxu3  ;;  %v102_v18 = vld [vmem:[#allocation2 + $0x8] sm:$0x1f] }
 0x33d   :  { %v428_v47 = vadd.f32 %v2691_v36, %v102_v18 }
 0x33e   :  { %v1215_v11 = vld [vmem:[#allocation3 + $0x8] sm:$0x1f] }
 0x33f   :  { %v1249_v7 = vperm.slane %v1215_v11, 4 }
 0x341   :  { %1799 = vrcp.f32 %v1249_v7  ;;  %vm1256_vm8 = vweird.f32 %v1249_v7  ;;  %v1262_v36 = vand.u32 2147483648, %v1249_v7  ;;  %v1260_v46 = vand.u32 2147483647, %v1249_v7 }
 0x343   :  { %v1263_v30 = vor.u32 1.1754944e-38, %v1262_v36  ;;  %vm1261_vm11 = vcmp.eq.f32.partialorder %v1260_v46, 8.507059e+37 }
 0x344   :  { %1197 = vmatpush.bf16.xpose.msrb.mxu2 %v1171_v25 }
 0x34c   :  { %1198 = vmatpush.bf16.xpose.msrb.mxu2 %v1170_v63 }
 0x353   :  { %1199 = vmatmul.bf16.vlgmr.msrb.gmra.mxu2 %v2645_v13  ;;  %v1800_v13 = vpop.eup %1799 }
 0x354   :  { %v1252_v63 = vmul.f32 %v1800_v13, %v1249_v7  ;;  %vm1257_vm9 = vweird.f32 %v1800_v13 }
 0x355   :  { %vm1258_vm10 = vmor %vm1256_vm8, %vm1257_vm9 }
 0x356   :  { %v1253_v40 = vsub.f32 1.0, %v1252_v63 }
 0x358   :  { %v1254_v12 = vmul.f32 %v1800_v13, %v1253_v40 }
 0x35a   :  { %v1255_v62 = vadd.f32 %v1800_v13, %v1254_v12 }
 0x35c   :  { %v1259_v58 = vsel %vm1258_vm10, %v1800_v13, %v1255_v62 }
 0x35d   :  { %v1264_v42 = vsel %vm1261_vm11, %v1263_v30, %v1259_v58 }
 0x35e   :  { %v1265_v39 = vmul.f32 %v1264_v42, %v1215_v11 }
 0x396   :  { %v974_v0 = vpop.f32.mrf.mxu2 }
 0x397   :  { %v979_v51 = vadd.f32 %v974_v0, %v428_v47 }
 0x399   :  { %1207 = vst [vmem:[#allocation2 + $0x8] sm:$0x1f] %v979_v51 }
 0x39e   :  { %v976_v3 = vpop.f32.mrf.mxu2 }
 0x3a0   :  { %v1214_v25 = vld [vmem:[#allocation2 + $0x8] sm:$0x1f] }
 0x3a1   :  { %v1218_v16 = vperm.slane %v1214_v25, 4 }
 0x3a3   :  { %1801 = vrcp.f32 %v1218_v16  ;;  %v1245_v34 = vand.u32 2147483648, %v1218_v16  ;;  %v1243_v22 = vand.u32 2147483647, %v1218_v16  ;;  %vm1239_vm13 = vweird.f32 %v1218_v16 }
 0x3a5   :  { %v1246_v6 = vor.u32 1.1754944e-38, %v1245_v34  ;;  %vm1244_vm15 = vcmp.eq.f32.partialorder %v1243_v22, 8.507059e+37 }
 0x3a9   :  { %v1802_v26 = vpop.eup %1801 }
 0x3aa   :  { %v1235_v33 = vmul.f32 %v1802_v26, %v1218_v16  ;;  %vm1240_vm12 = vweird.f32 %v1802_v26 }
 0x3ab   :  { %vm1241_vm14 = vmor %vm1239_vm13, %vm1240_vm12 }
 0x3ac   :  { %v1236_v43 = vsub.f32 1.0, %v1235_v33 }
 0x3ae   :  { %v1237_v50 = vmul.f32 %v1802_v26, %v1236_v43 }
 0x3b0   :  { %v1238_v48 = vadd.f32 %v1802_v26, %v1237_v50 }
 0x3b2   :  { %v1242_v21 = vsel %vm1241_vm14, %v1802_v26, %v1238_v48 }
 0x3b3   :  { %v1247_v24 = vsel %vm1244_vm15, %v1246_v6, %v1242_v21 }
 0x3b4   :  { %v1248_v35 = vmul.f32 %v1247_v24, %v1214_v25 }
 0x3b6   :  { %1530 = vmatpush.msk.msrb.mxu3 %vm204_vm0, %v1248_v35 }
 0x3b7   :  { %1531 = vmatmul.msk.f32.vlgmr.msrb.gmra.mxu3 %vm107_vm1, %v1282_v38 }
 0x3b8   :  { %1532 = vmatpush.msk.msra.mxu3 %vm204_vm0, %v1265_v39 }
 0x3ba   :  { %v1309_v44 = vpop.f32.mrf.mxu3 }
 0x3bf   :  { %1533 = vmatmul.msk.f32.vlgmr.msra.gmra.mxu3 %vm107_vm1, %v1281_v17 }
 0x3d6   :  { %v1200_v54 = vpop.f32.mrf.mxu2 }
 0x3d7   :  { %v1205_v14 = vadd.f32 %v1200_v54, %v751_v60 }
 0x3d9   :  { %1209 = vst [vmem:[#allocation3] sm:$0x1f] %v1205_v14 }
 0x3de   :  { %v1202_v57 = vpop.f32.mrf.mxu2 }
 0x3e0   :  { %v1216_v23 = vld [vmem:[#allocation3] sm:$0x1f] }
 0x3e1   :  { %v1250_v2 = vperm.slane %v1216_v23, 4 }
 0x3e3   :  { %1803 = vrcp.f32 %v1250_v2  ;;  %v1277_v4 = vand.u32 2147483648, %v1250_v2  ;;  %v1275_v5 = vand.u32 2147483647, %v1250_v2  ;;  %vm1271_vm3 = vweird.f32 %v1250_v2 }
 0x3e5   :  { %v1278_v27 = vor.u32 1.1754944e-38, %v1277_v4  ;;  %vm1276_vm5 = vcmp.eq.f32.partialorder %v1275_v5, 8.507059e+37 }
 0x3e9   :  { %v1804_v32 = vpop.eup %1803 }
 0x3ea   :  { %v1267_v61 = vmul.f32 %v1804_v32, %v1250_v2  ;;  %vm1272_vm2 = vweird.f32 %v1804_v32 }
 0x3eb   :  { %vm1273_vm4 = vmor %vm1271_vm3, %vm1272_vm2 }
 0x3ec   :  { %v1268_v45 = vsub.f32 1.0, %v1267_v61 }
 0x3ee   :  { %v1269_v52 = vmul.f32 %v1804_v32, %v1268_v45 }
 0x3f0   :  { %v1270_v28 = vadd.f32 %v1804_v32, %v1269_v52 }
 0x3f2   :  { %v1274_v9 = vsel %vm1273_vm4, %v1804_v32, %v1270_v28 }
 0x3f3   :  { %v1279_v10 = vsel %vm1276_vm5, %v1278_v27, %v1274_v9 }
 0x3f4   :  { %v1280_v29 = vmul.f32 %v1279_v10, %v1216_v23 }
 0x3f6   :  { %1534 = vmatpush.msk.msrb.mxu3 %vm204_vm0, %v1280_v29 }
 0x3f7   :  { %1535 = vmatmul.msk.f32.vlgmr.msrb.gmra.mxu3 %vm107_vm1, %v1281_v17 }
 0x43a   :  { %v1329_v55 = vpop.f32.mrf.mxu3 }
 0x442   :  { %v1358_v49 = vpop.f32.mrf.mxu3 }
 0x443   :  { %v1359_v8 = vadd.f32 %v1358_v49, %v1309_v44 }
 0x47a   :  { %v1378_v15 = vpop.f32.mrf.mxu3 }
 0x47b   :  { %v1379_v19 = vadd.f32 %v1378_v15, %v1329_v55 }
 0x47d   :  { %v1384_v53 = vrot.slane %v1379_v19, 4 }
 0x47f   :  { %v1385_v20 = vsel %vm204_vm0, %v1359_v8, %v1384_v53 }
 0x480   :  { %v1387_v59 = vsub.f32 %v1381_v41, %v1385_v20 }
 0x482   :  { %1388 = vst [vmem:[%s2753_s8] sm:$0xff] %v1387_v59 }

</bundles_post_ra>
